<compile_context>
chip_gen: v7x
topology: tpu7x:2x2x1
jax: 0.10.0
libtpu: 0.0.40
codegen_flags: <defaults>
</compile_context>

<pallas_src>
from functools import partial

import jax
import jax.numpy as jnp
from jax.experimental import pallas as pl
from jax.experimental.pallas import tpu as pltpu

# ---- static module "constructor" arguments -------------------------------
MASK_WEIGHT = 1.0
SDF_CONSISTENCY_WEIGHT = 0.1
EIKONAL_WEIGHT = 0.1
NORMAL_WEIGHT = 0.05
SEGMENT_WEIGHT = 0.05
# lbs_weight = 0, vgg_feature_weight = 0, deform_pcd / latent_reg disabled.

MAX_TILE_ROWS_DEFAULT = 1024  # 19 streams x (1024,128) f32, double-buffered
                              # ~= 20 MiB -> under the 32 MiB scoped VMEM
                              # limit on v5e/v6e/v7x.  Do NOT raise to 2048.


def _acc8(x):
    # Reduce a (k*8, 128)-shaped block to an (8, 128) partial sum using only
    # whole-vreg adds (leading-axis reduce) -- no cross-lane/sublane XLU work.
    return jnp.sum(x.reshape(-1, 8, 128), axis=0)


# ---- fused loss kernel -----------------------------------------------------
def _loss_kernel(pm_ref, om_ref, rgbp_ref, rgbg_ref, n_ref, mo_ref,
                 og_ref, rg_ref, seg_ref, sdf_ref, grad_ref,
                 out_ref, acc_ref, *, ncores):
    # Read all grid coordinates ONCE at the top level (never inside pl.when).
    t = pl.program_id(1)
    nt = pl.num_programs(1)
    core = pl.program_id(0)

    @pl.when(t == 0)
    def _init():
        acc_ref[...] = jnp.zeros_like(acc_ref)

    f32 = jnp.float32
    om = om_ref[...].astype(f32)          # (tile_r, 128) object_mask
    mo = mo_ref[...].astype(f32)          # (tile_r, 128) mask_object

    # mask loss partial: sum |pred_mask - object_mask|
    acc_ref[0] += _acc8(jnp.abs(pm_ref[...].astype(f32) - om))

    # rgb loss partial: sum |rgb_pred - rgb_gt| (lane-dense flat block)
    acc_ref[1] += _acc8(jnp.abs(rgbp_ref[...].astype(f32)
                                - rgbg_ref[...].astype(f32)))

    # normal compose + L1 partials.  Mask algebra hoisted out of the channel
    # loop:  n_orig = n*a + b,  n_rend = n*c + d.
    c = om * mo
    a = om - c
    b = c + (1.0 - om)
    d = 1.0 - c
    npart = jnp.zeros((8, 128), f32)
    for ch in range(3):
        n_c = n_ref[ch].astype(f32)                       # (tile_r, 128)
        npart += _acc8(jnp.abs(n_c * a + b - og_ref[ch].astype(f32)))
        npart += _acc8(jnp.abs(n_c * c + d - rg_ref[ch].astype(f32)))
    acc_ref[2] += npart

    # segment loss partial: BCE-with-logits against mask_object
    x = seg_ref[...].astype(f32)
    bce = jnp.maximum(x, 0.0) - x * mo + jnp.log1p(jnp.exp(-jnp.abs(x)))
    acc_ref[3] += _acc8(bce)

    # Epilogue: single cross-lane reduction of each accumulator to a scalar,
    # plus the small resident sdf / eikonal terms.
    @pl.when(t == nt - 1)
    def _finalize():
        out_ref[0, 0] = jnp.sum(acc_ref[0])   # mask |.| sum
        out_ref[0, 1] = jnp.sum(acc_ref[1])   # rgb  |.| sum
        out_ref[0, 2] = jnp.sum(acc_ref[2])   # normal (orig + rend) |.| sum
        out_ref[0, 3] = jnp.sum(acc_ref[3])   # segment BCE sum

        def _small_terms():
            sdf = sdf_ref[...].astype(f32)
            out_ref[0, 4] = jnp.sum(sdf * sdf)
            gx = grad_ref[0].astype(f32)
            gy = grad_ref[1].astype(f32)
            gz = grad_ref[2].astype(f32)
            gnorm = jnp.sqrt(gx * gx + gy * gy + gz * gz)
            out_ref[0, 5] = jnp.sum((gnorm - 1.0) ** 2)

        if ncores == 1:
            # Single-core grid (default): no nested core gating at all.
            _small_terms()
        else:
            # Multi-core grid: only core 0 contributes the small terms; other
            # cores must still fully write their output row.
            @pl.when(core == 0)
            def _core0():
                _small_terms()

            @pl.when(core != 0)
            def _other_cores():
                out_ref[0, 4] = jnp.float32(0.0)
                out_ref[0, 5] = jnp.float32(0.0)


def _pick_tile_rows(rows_per_core, max_tile_rows):
    t = min(max_tile_rows, rows_per_core)
    t -= t % 8
    while t >= 8:
        if rows_per_core % t == 0:
            return t
        t -= 8
    raise ValueError("rows per core must be a multiple of 8")


@partial(jax.jit, static_argnames=("max_tile_rows", "ncores"))
def pegasus_loss(pred_mask, obj_mask, rgb_pred, rgb_gt, sdf, grad,
                 normal_cm, mask_obj, normal_orig_gt_cm, normal_rend_gt_cm,
                 segment, max_tile_rows=MAX_TILE_ROWS_DEFAULT, ncores=1):
    """Fused PEGASUS loss.

    NOTE (review item 1): `normal_cm`, `normal_orig_gt_cm`,
    `normal_rend_gt_cm` are expected CHANNEL-MAJOR (3, P); this makes all
    wrapper-side layout work free row-major reshapes (no HBM transpose).
    Set ncores=2 only on chips with 2 TensorCores (v7x); the default ncores=1
    avoids redundant grid steps on single-TC v5e/v6e.
    """
    f32 = jnp.float32
    P = pred_mask.size
    NS = sdf.size
    NG = grad.shape[0]
    assert grad.shape[1] == 3 and grad.ndim == 2
    assert normal_cm.shape[0] == 3 and normal_cm.size == 3 * P
    assert P % 128 == 0 and NS % 128 == 0 and NG % 128 == 0
    rows = P // 128
    assert rows % (8 * ncores) == 0, "need rows multiple of 8 per core"

    rows_per_core = rows // ncores
    tile_r = _pick_tile_rows(rows_per_core, max_tile_rows)
    tiles_per_core = rows_per_core // tile_r

    # ---- wrapper-side layout plumbing: free reshapes only ------------------
    # Pixel tensors keep their input dtype (f32 or bf16); the kernel upcasts.
    pm = pred_mask.reshape(rows, 128)
    om = obj_mask.reshape(rows, 128)
    mo = mask_obj.reshape(rows, 128)
    seg = segment.reshape(rows, 128)
    rgbp = rgb_pred.reshape(3 * rows, 128)                 # free reshape
    rgbg = rgb_gt.reshape(3 * rows, 128)                   # free reshape
    nrm = normal_cm.reshape(3, rows, 128)                  # channel-major, free
    og = normal_orig_gt_cm.reshape(3, rows, 128)           # free
    rg = normal_rend_gt_cm.reshape(3, rows, 128)           # free
    sdf2 = sdf.astype(f32).reshape(NS // 128, 128)
    grd = grad.astype(f32).T.reshape(3, NG // 128, 128)    # tiny; negligible

    def px_map(c, t):
        return (c * tiles_per_core + t, 0)

    def ch_map(c, t):
        return (0, c * tiles_per_core + t, 0)

    px_spec = pl.BlockSpec((tile_r, 128), px_map)
    rgb_spec = pl.BlockSpec((3 * tile_r, 128), px_map)
    ch_spec = pl.BlockSpec((3, tile_r, 128), ch_map)
    sdf_spec = pl.BlockSpec((NS // 128, 128), lambda c, t: (0, 0))
    grad_spec = pl.BlockSpec((3, NG // 128, 128), lambda c, t: (0, 0, 0))

    if ncores > 1:
        dims = (pltpu.CORE_PARALLEL, pltpu.ARBITRARY)
    else:
        dims = ("arbitrary", "arbitrary")

    out = pl.pallas_call(
        partial(_loss_kernel, ncores=ncores),
        out_shape=jax.ShapeDtypeStruct((ncores, 6), jnp.float32),
        grid_spec=pltpu.PrefetchScalarGridSpec(
            num_scalar_prefetch=0,
            grid=(ncores, tiles_per_core),
            in_specs=[px_spec, px_spec, rgb_spec, rgb_spec, ch_spec,
                      px_spec, ch_spec, ch_spec, px_spec, sdf_spec, grad_spec],
            out_specs=pl.BlockSpec((1, 6), lambda c, t: (c, 0),
                                   memory_space=pltpu.MemorySpace.SMEM),
            scratch_shapes=[pltpu.VMEM((4, 8, 128), jnp.float32)]),
        compiler_params=pltpu.CompilerParams(
            dimension_semantics=dims,
            vmem_limit_bytes=32 * 1024 * 1024),
    )(pm, om, rgbp, rgbg, nrm, mo, og, rg, seg, sdf2, grd)

    # ---- final means / weighting (6 scalars; negligible) -------------------
    sums = jnp.sum(out, axis=0)
    mask_loss = sums[0] / P
    rgb_loss = sums[1] / (3 * P)
    normal_loss = sums[2] / (3 * P)
    segment_loss = sums[3] / P
    sdf_loss = sums[4] / NS
    eik_loss = sums[5] / NG
    loss = (rgb_loss
            + MASK_WEIGHT * mask_loss
            + SDF_CONSISTENCY_WEIGHT * sdf_loss
            + EIKONAL_WEIGHT * eik_loss
            + NORMAL_WEIGHT * normal_loss
            + SEGMENT_WEIGHT * segment_loss)
    return {
        'loss': loss, 'rgb_loss': rgb_loss, 'mask_loss': mask_loss,
        'sdf_consistency': sdf_loss, 'eikonal': eik_loss,
        'normal_loss': normal_loss, 'segment_loss': segment_loss,
    }


# ---- pure-JAX reference (mirrors the PyTorch forward) ----------------------
def pegasus_loss_ref(pred_mask, obj_mask, rgb_pred, rgb_gt, sdf, grad,
                     normal, mask_obj, normal_orig_gt, normal_rend_gt, segment):
    mask_loss = jnp.mean(jnp.abs(pred_mask - obj_mask))
    rgb_loss = jnp.mean(jnp.abs(rgb_pred - rgb_gt))
    sdf_loss = jnp.mean(sdf * sdf)
    eik = jnp.mean((jnp.linalg.norm(grad, axis=1) - 1.0) ** 2)
    n_orig = normal * (1.0 - mask_obj) + mask_obj
    n_orig = n_orig * obj_mask + (1.0 - obj_mask)
    n_rend = normal * mask_obj + (1.0 - mask_obj)
    n_rend = n_rend * obj_mask + (1.0 - obj_mask)
    normal_loss = (jnp.mean(jnp.abs(n_orig - normal_orig_gt)) +
                   jnp.mean(jnp.abs(n_rend - normal_rend_gt)))
    bce = jnp.maximum(segment, 0.0) - segment * mask_obj + \
        jnp.log1p(jnp.exp(-jnp.abs(segment)))
    segment_loss = jnp.mean(bce)
    loss = (rgb_loss + MASK_WEIGHT * mask_loss
            + SDF_CONSISTENCY_WEIGHT * sdf_loss + EIKONAL_WEIGHT * eik
            + NORMAL_WEIGHT * normal_loss + SEGMENT_WEIGHT * segment_loss)
    return {'loss': loss, 'rgb_loss': rgb_loss, 'mask_loss': mask_loss,
            'sdf_consistency': sdf_loss, 'eikonal': eik,
            'normal_loss': normal_loss, 'segment_loss': segment_loss}


if __name__ == "__main__":
    B, H, W = 2, 64, 64
    P = B * H * W            # 8192 flattened pixels (rows = 64)
    NS, NG = 256, 256        # sdf samples / eikonal samples

    key = jax.random.PRNGKey(0)
    ks = jax.random.split(key, 12)

    pred_mask = jax.random.uniform(ks[0], (P, 1), jnp.float32)
    obj_mask = (jax.random.uniform(ks[1], (P, 1)) > 0.5).astype(jnp.float32)
    rgb_pred = jax.random.uniform(ks[2], (P, 3), jnp.float32)
    rgb_gt = jax.random.uniform(ks[3], (P, 3), jnp.float32)
    sdf = 0.1 * jax.random.normal(ks[4], (NS, 1), jnp.float32)
    grad = jax.random.normal(ks[5], (NG, 3), jnp.float32)
    # Normal tensors produced channel-major (3, P) upstream (review item 1).
    normal_cm = jax.random.uniform(ks[6], (3, P), jnp.float32) * 2.0 - 1.0
    mask_obj = (jax.random.uniform(ks[7], (P, 1)) > 0.5).astype(jnp.float32)
    normal_orig_gt_cm = jax.random.uniform(ks[8], (3, P), jnp.float32)
    normal_rend_gt_cm = jax.random.uniform(ks[9], (3, P), jnp.float32)
    segment = jax.random.normal(ks[10], (P, 1), jnp.float32)

    # Reference uses the PyTorch-natural (P, 3) layout; same elements.
    ref = pegasus_loss_ref(pred_mask, obj_mask, rgb_pred, rgb_gt, sdf, grad,
                           normal_cm.T, mask_obj, normal_orig_gt_cm.T,
                           normal_rend_gt_cm.T, segment)

    # Check both the large-tile path (single grid step) and a small tile
    # (exercises the multi-step accumulator init/accumulate/finalize).
    for max_tile in (MAX_TILE_ROWS_DEFAULT, 8):
        out = pegasus_loss(pred_mask, obj_mask, rgb_pred, rgb_gt, sdf, grad,
                           normal_cm, mask_obj, normal_orig_gt_cm,
                           normal_rend_gt_cm, segment,
                           max_tile_rows=max_tile)
        jax.block_until_ready(out)
        for k in out:
            assert jnp.allclose(out[k], ref[k], rtol=1e-4, atol=1e-5), (
                f"mismatch in {k} (max_tile_rows={max_tile}): "
                f"{out[k]} vs {ref[k]}")

    print("KERNEL_OK")
</pallas_src>

<mosaic_0001>
module attributes {stable_mosaic.version = 11 : i64} {
  func.func @_loss_kernel(%arg0: i32, %arg1: i32, %arg2: memref<64x128xf32, #tpu.memory_space<vmem>>, %arg3: memref<64x128xf32, #tpu.memory_space<vmem>>, %arg4: memref<192x128xf32, #tpu.memory_space<vmem>>, %arg5: memref<192x128xf32, #tpu.memory_space<vmem>>, %arg6: memref<3x64x128xf32, #tpu.memory_space<vmem>>, %arg7: memref<64x128xf32, #tpu.memory_space<vmem>>, %arg8: memref<3x64x128xf32, #tpu.memory_space<vmem>>, %arg9: memref<3x64x128xf32, #tpu.memory_space<vmem>>, %arg10: memref<64x128xf32, #tpu.memory_space<vmem>>, %arg11: memref<2x128xf32, #tpu.memory_space<vmem>>, %arg12: memref<3x2x128xf32, #tpu.memory_space<vmem>>, %arg13: memref<1x6xf32, #tpu.memory_space<smem>>, %arg14: memref<4x8x128xf32, #tpu.memory_space<vmem>>) attributes {dimension_semantics = [#tpu.dimension_semantics<arbitrary>, #tpu.dimension_semantics<arbitrary>], iteration_bounds = array<i64: 1, 1>, scalar_prefetch = 0 : i64, scratch_operands = 1 : i64, tpu.core_type = #tpu.core_type<tc>, window_params = [{transform_indices = @transform_0, window_bounds = array<i64: 64, 128>}, {transform_indices = @transform_1, window_bounds = array<i64: 64, 128>}, {transform_indices = @transform_2, window_bounds = array<i64: 192, 128>}, {transform_indices = @transform_3, window_bounds = array<i64: 192, 128>}, {transform_indices = @transform_4, window_bounds = array<i64: 3, 64, 128>}, {transform_indices = @transform_5, window_bounds = array<i64: 64, 128>}, {transform_indices = @transform_6, window_bounds = array<i64: 3, 64, 128>}, {transform_indices = @transform_7, window_bounds = array<i64: 3, 64, 128>}, {transform_indices = @transform_8, window_bounds = array<i64: 64, 128>}, {pipeline_mode = #tpu.pipeline_mode<synchronous>, transform_indices = @transform_9, window_bounds = array<i64: 2, 128>}, {pipeline_mode = #tpu.pipeline_mode<synchronous>, transform_indices = @transform_10, window_bounds = array<i64: 3, 2, 128>}, {transform_indices = @transform_11, window_bounds = array<i64: 1, 6>}]} {
    %c0_i32 = arith.constant 0 : i32
    %0 = arith.cmpi eq, %arg1, %c0_i32 : i32
    %1 = arith.extui %0 : i1 to i32
    %c0_i32_0 = arith.constant 0 : i32
    %2 = arith.cmpi ne, %1, %c0_i32_0 : i32
    scf.if %2 {
      %cst_75 = arith.constant 0.000000e+00 : f32
      %124 = vector.broadcast %cst_75 : f32 to vector<4x8x128xf32>
      %c0_76 = arith.constant 0 : index
      %c0_77 = arith.constant 0 : index
      %c0_78 = arith.constant 0 : index
      %125 = vector.load %arg14[%c0_76, %c0_77, %c0_78] : memref<4x8x128xf32, #tpu.memory_space<vmem>>, vector<4x8x128xf32>
      tpu.vector_store %arg14[%c0_76, %c0_77, %c0_78], %124 {strides = array<i32>} : memref<4x8x128xf32, #tpu.memory_space<vmem>>, vector<4x8x128xf32>,
    } else {
    }
    %c0 = arith.constant 0 : index
    %c0_1 = arith.constant 0 : index
    %3 = vector.load %arg3[%c0, %c0_1] : memref<64x128xf32, #tpu.memory_space<vmem>>, vector<64x128xf32>
    %c0_2 = arith.constant 0 : index
    %c0_3 = arith.constant 0 : index
    %4 = vector.load %arg7[%c0_2, %c0_3] : memref<64x128xf32, #tpu.memory_space<vmem>>, vector<64x128xf32>
    %c0_4 = arith.constant 0 : index
    %c0_5 = arith.constant 0 : index
    %c0_6 = arith.constant 0 : index
    %5 = vector.load %arg14[%c0_4, %c0_5, %c0_6] : memref<4x8x128xf32, #tpu.memory_space<vmem>>, vector<1x8x128xf32>
    %6 = vector.shape_cast %5 : vector<1x8x128xf32> to vector<8x128xf32>
    %c0_7 = arith.constant 0 : index
    %c0_8 = arith.constant 0 : index
    %7 = vector.load %arg2[%c0_7, %c0_8] : memref<64x128xf32, #tpu.memory_space<vmem>>, vector<64x128xf32>
    %8 = arith.subf %7, %3 : vector<64x128xf32>
    %9 = math.absf %8 : vector<64x128xf32>
    %10 = vector.shape_cast %9 : vector<64x128xf32> to vector<8x8x128xf32>
    %cst = arith.constant dense<0.000000e+00> : vector<8x128xf32>
    %11 = vector.multi_reduction <add>, %10, %cst [0] : vector<8x8x128xf32> to vector<8x128xf32>
    %12 = arith.addf %6, %11 : vector<8x128xf32>
    %c0_9 = arith.constant 0 : index
    %c0_10 = arith.constant 0 : index
    %c0_11 = arith.constant 0 : index
    %13 = vector.load %arg14[%c0_9, %c0_10, %c0_11] : memref<4x8x128xf32, #tpu.memory_space<vmem>>, vector<1x8x128xf32>
    %14 = vector.shape_cast %13 : vector<1x8x128xf32> to vector<8x128xf32>
    %15 = vector.shape_cast %12 : vector<8x128xf32> to vector<1x8x128xf32>
    tpu.vector_store %arg14[%c0_9, %c0_10, %c0_11], %15 {strides = array<i32>} : memref<4x8x128xf32, #tpu.memory_space<vmem>>, vector<1x8x128xf32>,
    %c1 = arith.constant 1 : index
    %c0_12 = arith.constant 0 : index
    %c0_13 = arith.constant 0 : index
    %16 = vector.load %arg14[%c1, %c0_12, %c0_13] : memref<4x8x128xf32, #tpu.memory_space<vmem>>, vector<1x8x128xf32>
    %17 = vector.shape_cast %16 : vector<1x8x128xf32> to vector<8x128xf32>
    %c0_14 = arith.constant 0 : index
    %c0_15 = arith.constant 0 : index
    %18 = vector.load %arg4[%c0_14, %c0_15] : memref<192x128xf32, #tpu.memory_space<vmem>>, vector<192x128xf32>
    %c0_16 = arith.constant 0 : index
    %c0_17 = arith.constant 0 : index
    %19 = vector.load %arg5[%c0_16, %c0_17] : memref<192x128xf32, #tpu.memory_space<vmem>>, vector<192x128xf32>
    %20 = arith.subf %18, %19 : vector<192x128xf32>
    %21 = math.absf %20 : vector<192x128xf32>
    %22 = vector.shape_cast %21 : vector<192x128xf32> to vector<24x8x128xf32>
    %cst_18 = arith.constant dense<0.000000e+00> : vector<8x128xf32>
    %23 = vector.multi_reduction <add>, %22, %cst_18 [0] : vector<24x8x128xf32> to vector<8x128xf32>
    %24 = arith.addf %17, %23 : vector<8x128xf32>
    %c1_19 = arith.constant 1 : index
    %c0_20 = arith.constant 0 : index
    %c0_21 = arith.constant 0 : index
    %25 = vector.load %arg14[%c1_19, %c0_20, %c0_21] : memref<4x8x128xf32, #tpu.memory_space<vmem>>, vector<1x8x128xf32>
    %26 = vector.shape_cast %25 : vector<1x8x128xf32> to vector<8x128xf32>
    %27 = vector.shape_cast %24 : vector<8x128xf32> to vector<1x8x128xf32>
    tpu.vector_store %arg14[%c1_19, %c0_20, %c0_21], %27 {strides = array<i32>} : memref<4x8x128xf32, #tpu.memory_space<vmem>>, vector<1x8x128xf32>,
    %28 = arith.mulf %3, %4 : vector<64x128xf32>
    %29 = arith.subf %3, %28 : vector<64x128xf32>
    %cst_22 = arith.constant 1.000000e+00 : f32
    %30 = vector.broadcast %cst_22 : f32 to vector<64x128xf32>
    %31 = arith.subf %30, %3 : vector<64x128xf32>
    %32 = arith.addf %28, %31 : vector<64x128xf32>
    %cst_23 = arith.constant 1.000000e+00 : f32
    %33 = vector.broadcast %cst_23 : f32 to vector<64x128xf32>
    %34 = arith.subf %33, %28 : vector<64x128xf32>
    %cst_24 = arith.constant 0.000000e+00 : f32
    %35 = vector.broadcast %cst_24 : f32 to vector<8x128xf32>
    %c0_25 = arith.constant 0 : index
    %c0_26 = arith.constant 0 : index
    %c0_27 = arith.constant 0 : index
    %36 = vector.load %arg6[%c0_25, %c0_26, %c0_27] : memref<3x64x128xf32, #tpu.memory_space<vmem>>, vector<1x64x128xf32>
    %37 = vector.shape_cast %36 : vector<1x64x128xf32> to vector<64x128xf32>
    %38 = arith.mulf %37, %29 : vector<64x128xf32>
    %39 = arith.addf %38, %32 : vector<64x128xf32>
    %c0_28 = arith.constant 0 : index
    %c0_29 = arith.constant 0 : index
    %c0_30 = arith.constant 0 : index
    %40 = vector.load %arg8[%c0_28, %c0_29, %c0_30] : memref<3x64x128xf32, #tpu.memory_space<vmem>>, vector<1x64x128xf32>
    %41 = vector.shape_cast %40 : vector<1x64x128xf32> to vector<64x128xf32>
    %42 = arith.subf %39, %41 : vector<64x128xf32>
    %43 = math.absf %42 : vector<64x128xf32>
    %44 = vector.shape_cast %43 : vector<64x128xf32> to vector<8x8x128xf32>
    %cst_31 = arith.constant dense<0.000000e+00> : vector<8x128xf32>
    %45 = vector.multi_reduction <add>, %44, %cst_31 [0] : vector<8x8x128xf32> to vector<8x128xf32>
    %46 = arith.addf %35, %45 : vector<8x128xf32>
    %47 = arith.mulf %37, %28 : vector<64x128xf32>
    %48 = arith.addf %47, %34 : vector<64x128xf32>
    %c0_32 = arith.constant 0 : index
    %c0_33 = arith.constant 0 : index
    %c0_34 = arith.constant 0 : index
    %49 = vector.load %arg9[%c0_32, %c0_33, %c0_34] : memref<3x64x128xf32, #tpu.memory_space<vmem>>, vector<1x64x128xf32>
    %50 = vector.shape_cast %49 : vector<1x64x128xf32> to vector<64x128xf32>
    %51 = arith.subf %48, %50 : vector<64x128xf32>
    %52 = math.absf %51 : vector<64x128xf32>
    %53 = vector.shape_cast %52 : vector<64x128xf32> to vector<8x8x128xf32>
    %cst_35 = arith.constant dense<0.000000e+00> : vector<8x128xf32>
    %54 = vector.multi_reduction <add>, %53, %cst_35 [0] : vector<8x8x128xf32> to vector<8x128xf32>
    %55 = arith.addf %46, %54 : vector<8x128xf32>
    %c1_36 = arith.constant 1 : index
    %c0_37 = arith.constant 0 : index
    %c0_38 = arith.constant 0 : index
    %56 = vector.load %arg6[%c1_36, %c0_37, %c0_38] : memref<3x64x128xf32, #tpu.memory_space<vmem>>, vector<1x64x128xf32>
    %57 = vector.shape_cast %56 : vector<1x64x128xf32> to vector<64x128xf32>
    %58 = arith.mulf %57, %29 : vector<64x128xf32>
    %59 = arith.addf %58, %32 : vector<64x128xf32>
    %c1_39 = arith.constant 1 : index
    %c0_40 = arith.constant 0 : index
    %c0_41 = arith.constant 0 : index
    %60 = vector.load %arg8[%c1_39, %c0_40, %c0_41] : memref<3x64x128xf32, #tpu.memory_space<vmem>>, vector<1x64x128xf32>
    %61 = vector.shape_cast %60 : vector<1x64x128xf32> to vector<64x128xf32>
    %62 = arith.subf %59, %61 : vector<64x128xf32>
    %63 = math.absf %62 : vector<64x128xf32>
    %64 = vector.shape_cast %63 : vector<64x128xf32> to vector<8x8x128xf32>
    %cst_42 = arith.constant dense<0.000000e+00> : vector<8x128xf32>
    %65 = vector.multi_reduction <add>, %64, %cst_42 [0] : vector<8x8x128xf32> to vector<8x128xf32>
    %66 = arith.addf %55, %65 : vector<8x128xf32>
    %67 = arith.mulf %57, %28 : vector<64x128xf32>
    %68 = arith.addf %67, %34 : vector<64x128xf32>
    %c1_43 = arith.constant 1 : index
    %c0_44 = arith.constant 0 : index
    %c0_45 = arith.constant 0 : index
    %69 = vector.load %arg9[%c1_43, %c0_44, %c0_45] : memref<3x64x128xf32, #tpu.memory_space<vmem>>, vector<1x64x128xf32>
    %70 = vector.shape_cast %69 : vector<1x64x128xf32> to vector<64x128xf32>
    %71 = arith.subf %68, %70 : vector<64x128xf32>
    %72 = math.absf %71 : vector<64x128xf32>
    %73 = vector.shape_cast %72 : vector<64x128xf32> to vector<8x8x128xf32>
    %cst_46 = arith.constant dense<0.000000e+00> : vector<8x128xf32>
    %74 = vector.multi_reduction <add>, %73, %cst_46 [0] : vector<8x8x128xf32> to vector<8x128xf32>
    %75 = arith.addf %66, %74 : vector<8x128xf32>
    %c2 = arith.constant 2 : index
    %c0_47 = arith.constant 0 : index
    %c0_48 = arith.constant 0 : index
    %76 = vector.load %arg6[%c2, %c0_47, %c0_48] : memref<3x64x128xf32, #tpu.memory_space<vmem>>, vector<1x64x128xf32>
    %77 = vector.shape_cast %76 : vector<1x64x128xf32> to vector<64x128xf32>
    %78 = arith.mulf %77, %29 : vector<64x128xf32>
    %79 = arith.addf %78, %32 : vector<64x128xf32>
    %c2_49 = arith.constant 2 : index
    %c0_50 = arith.constant 0 : index
    %c0_51 = arith.constant 0 : index
    %80 = vector.load %arg8[%c2_49, %c0_50, %c0_51] : memref<3x64x128xf32, #tpu.memory_space<vmem>>, vector<1x64x128xf32>
    %81 = vector.shape_cast %80 : vector<1x64x128xf32> to vector<64x128xf32>
    %82 = arith.subf %79, %81 : vector<64x128xf32>
    %83 = math.absf %82 : vector<64x128xf32>
    %84 = vector.shape_cast %83 : vector<64x128xf32> to vector<8x8x128xf32>
    %cst_52 = arith.constant dense<0.000000e+00> : vector<8x128xf32>
    %85 = vector.multi_reduction <add>, %84, %cst_52 [0] : vector<8x8x128xf32> to vector<8x128xf32>
    %86 = arith.addf %75, %85 : vector<8x128xf32>
    %87 = arith.mulf %77, %28 : vector<64x128xf32>
    %88 = arith.addf %87, %34 : vector<64x128xf32>
    %c2_53 = arith.constant 2 : index
    %c0_54 = arith.constant 0 : index
    %c0_55 = arith.constant 0 : index
    %89 = vector.load %arg9[%c2_53, %c0_54, %c0_55] : memref<3x64x128xf32, #tpu.memory_space<vmem>>, vector<1x64x128xf32>
    %90 = vector.shape_cast %89 : vector<1x64x128xf32> to vector<64x128xf32>
    %91 = arith.subf %88, %90 : vector<64x128xf32>
    %92 = math.absf %91 : vector<64x128xf32>
    %93 = vector.shape_cast %92 : vector<64x128xf32> to vector<8x8x128xf32>
    %cst_56 = arith.constant dense<0.000000e+00> : vector<8x128xf32>
    %94 = vector.multi_reduction <add>, %93, %cst_56 [0] : vector<8x8x128xf32> to vector<8x128xf32>
    %95 = arith.addf %86, %94 : vector<8x128xf32>
    %c2_57 = arith.constant 2 : index
    %c0_58 = arith.constant 0 : index
    %c0_59 = arith.constant 0 : index
    %96 = vector.load %arg14[%c2_57, %c0_58, %c0_59] : memref<4x8x128xf32, #tpu.memory_space<vmem>>, vector<1x8x128xf32>
    %97 = vector.shape_cast %96 : vector<1x8x128xf32> to vector<8x128xf32>
    %98 = arith.addf %97, %95 : vector<8x128xf32>
    %c2_60 = arith.constant 2 : index
    %c0_61 = arith.constant 0 : index
    %c0_62 = arith.constant 0 : index
    %99 = vector.load %arg14[%c2_60, %c0_61, %c0_62] : memref<4x8x128xf32, #tpu.memory_space<vmem>>, vector<1x8x128xf32>
    %100 = vector.shape_cast %99 : vector<1x8x128xf32> to vector<8x128xf32>
    %101 = vector.shape_cast %98 : vector<8x128xf32> to vector<1x8x128xf32>
    tpu.vector_store %arg14[%c2_60, %c0_61, %c0_62], %101 {strides = array<i32>} : memref<4x8x128xf32, #tpu.memory_space<vmem>>, vector<1x8x128xf32>,
    %c0_63 = arith.constant 0 : index
    %c0_64 = arith.constant 0 : index
    %102 = vector.load %arg10[%c0_63, %c0_64] : memref<64x128xf32, #tpu.memory_space<vmem>>, vector<64x128xf32>
    %cst_65 = arith.constant 0.000000e+00 : f32
    %103 = vector.broadcast %cst_65 : f32 to vector<64x128xf32>
    %104 = arith.maximumf %102, %103 : vector<64x128xf32>
    %105 = arith.mulf %102, %4 : vector<64x128xf32>
    %106 = arith.subf %104, %105 : vector<64x128xf32>
    %107 = math.absf %102 : vector<64x128xf32>
    %cst_66 = arith.constant 0.000000e+00 : f32
    %108 = vector.broadcast %cst_66 : f32 to vector<64x128xf32>
    %109 = arith.subf %108, %107 : vector<64x128xf32>
    %110 = math.exp %109 : vector<64x128xf32>
    %111 = math.log1p %110 : vector<64x128xf32>
    %112 = arith.addf %106, %111 : vector<64x128xf32>
    %c3 = arith.constant 3 : index
    %c0_67 = arith.constant 0 : index
    %c0_68 = arith.constant 0 : index
    %113 = vector.load %arg14[%c3, %c0_67, %c0_68] : memref<4x8x128xf32, #tpu.memory_space<vmem>>, vector<1x8x128xf32>
    %114 = vector.shape_cast %113 : vector<1x8x128xf32> to vector<8x128xf32>
    %115 = vector.shape_cast %112 : vector<64x128xf32> to vector<8x8x128xf32>
    %cst_69 = arith.constant dense<0.000000e+00> : vector<8x128xf32>
    %116 = vector.multi_reduction <add>, %115, %cst_69 [0] : vector<8x8x128xf32> to vector<8x128xf32>
    %117 = arith.addf %114, %116 : vector<8x128xf32>
    %c3_70 = arith.constant 3 : index
    %c0_71 = arith.constant 0 : index
    %c0_72 = arith.constant 0 : index
    %118 = vector.load %arg14[%c3_70, %c0_71, %c0_72] : memref<4x8x128xf32, #tpu.memory_space<vmem>>, vector<1x8x128xf32>
    %119 = vector.shape_cast %118 : vector<1x8x128xf32> to vector<8x128xf32>
    %120 = vector.shape_cast %117 : vector<8x128xf32> to vector<1x8x128xf32>
    tpu.vector_store %arg14[%c3_70, %c0_71, %c0_72], %120 {strides = array<i32>} : memref<4x8x128xf32, #tpu.memory_space<vmem>>, vector<1x8x128xf32>,
    %c0_i32_73 = arith.constant 0 : i32
    %121 = arith.cmpi eq, %arg1, %c0_i32_73 : i32
    %122 = arith.extui %121 : i1 to i32
    %c0_i32_74 = arith.constant 0 : i32
    %123 = arith.cmpi ne, %122, %c0_i32_74 : i32
    scf.if %123 {
      %c0_75 = arith.constant 0 : index
      %c0_76 = arith.constant 0 : index
      %c0_77 = arith.constant 0 : index
      %124 = vector.load %arg14[%c0_75, %c0_76, %c0_77] : memref<4x8x128xf32, #tpu.memory_space<vmem>>, vector<1x8x128xf32>
      %125 = vector.shape_cast %124 : vector<1x8x128xf32> to vector<8x128xf32>
      %126 = vector.shape_cast %125 : vector<8x128xf32> to vector<1x8x128xf32>
      %cst_78 = arith.constant dense<0.000000e+00> : vector<1xf32>
      %127 = vector.multi_reduction <add>, %126, %cst_78 [1, 2] : vector<1x8x128xf32> to vector<1xf32>
      %128 = vector.shape_cast %127 : vector<1xf32> to vector<1x1x1xf32>
      %129 = vector.extract %128[0, 0, 0] : f32 from vector<1x1x1xf32>
      %c0_79 = arith.constant 0 : index
      %c0_80 = arith.constant 0 : index
      %130 = memref.load %arg13[%c0_79, %c0_80] : memref<1x6xf32, #tpu.memory_space<smem>>
      memref.store %129, %arg13[%c0_79, %c0_80] : memref<1x6xf32, #tpu.memory_space<smem>>
      %c1_81 = arith.constant 1 : index
      %c0_82 = arith.constant 0 : index
      %c0_83 = arith.constant 0 : index
      %131 = vector.load %arg14[%c1_81, %c0_82, %c0_83] : memref<4x8x128xf32, #tpu.memory_space<vmem>>, vector<1x8x128xf32>
      %132 = vector.shape_cast %131 : vector<1x8x128xf32> to vector<8x128xf32>
      %133 = vector.shape_cast %132 : vector<8x128xf32> to vector<1x8x128xf32>
      %cst_84 = arith.constant dense<0.000000e+00> : vector<1xf32>
      %134 = vector.multi_reduction <add>, %133, %cst_84 [1, 2] : vector<1x8x128xf32> to vector<1xf32>
      %135 = vector.shape_cast %134 : vector<1xf32> to vector<1x1x1xf32>
      %136 = vector.extract %135[0, 0, 0] : f32 from vector<1x1x1xf32>
      %c0_85 = arith.constant 0 : index
      %c1_86 = arith.constant 1 : index
      %137 = memref.load %arg13[%c0_85, %c1_86] : memref<1x6xf32, #tpu.memory_space<smem>>
      memref.store %136, %arg13[%c0_85, %c1_86] : memref<1x6xf32, #tpu.memory_space<smem>>
      %c2_87 = arith.constant 2 : index
      %c0_88 = arith.constant 0 : index
      %c0_89 = arith.constant 0 : index
      %138 = vector.load %arg14[%c2_87, %c0_88, %c0_89] : memref<4x8x128xf32, #tpu.memory_space<vmem>>, vector<1x8x128xf32>
      %139 = vector.shape_cast %138 : vector<1x8x128xf32> to vector<8x128xf32>
      %140 = vector.shape_cast %139 : vector<8x128xf32> to vector<1x8x128xf32>
      %cst_90 = arith.constant dense<0.000000e+00> : vector<1xf32>
      %141 = vector.multi_reduction <add>, %140, %cst_90 [1, 2] : vector<1x8x128xf32> to vector<1xf32>
      %142 = vector.shape_cast %141 : vector<1xf32> to vector<1x1x1xf32>
      %143 = vector.extract %142[0, 0, 0] : f32 from vector<1x1x1xf32>
      %c0_91 = arith.constant 0 : index
      %c2_92 = arith.constant 2 : index
      %144 = memref.load %arg13[%c0_91, %c2_92] : memref<1x6xf32, #tpu.memory_space<smem>>
      memref.store %143, %arg13[%c0_91, %c2_92] : memref<1x6xf32, #tpu.memory_space<smem>>
      %c3_93 = arith.constant 3 : index
      %c0_94 = arith.constant 0 : index
      %c0_95 = arith.constant 0 : index
      %145 = vector.load %arg14[%c3_93, %c0_94, %c0_95] : memref<4x8x128xf32, #tpu.memory_space<vmem>>, vector<1x8x128xf32>
      %146 = vector.shape_cast %145 : vector<1x8x128xf32> to vector<8x128xf32>
      %147 = vector.shape_cast %146 : vector<8x128xf32> to vector<1x8x128xf32>
      %cst_96 = arith.constant dense<0.000000e+00> : vector<1xf32>
      %148 = vector.multi_reduction <add>, %147, %cst_96 [1, 2] : vector<1x8x128xf32> to vector<1xf32>
      %149 = vector.shape_cast %148 : vector<1xf32> to vector<1x1x1xf32>
      %150 = vector.extract %149[0, 0, 0] : f32 from vector<1x1x1xf32>
      %c0_97 = arith.constant 0 : index
      %c3_98 = arith.constant 3 : index
      %151 = memref.load %arg13[%c0_97, %c3_98] : memref<1x6xf32, #tpu.memory_space<smem>>
      memref.store %150, %arg13[%c0_97, %c3_98] : memref<1x6xf32, #tpu.memory_space<smem>>
      %c0_99 = arith.constant 0 : index
      %c0_100 = arith.constant 0 : index
      %152 = vector.load %arg11[%c0_99, %c0_100] : memref<2x128xf32, #tpu.memory_space<vmem>>, vector<2x128xf32>
      %153 = arith.mulf %152, %152 : vector<2x128xf32>
      %154 = vector.shape_cast %153 : vector<2x128xf32> to vector<1x2x128xf32>
      %cst_101 = arith.constant dense<0.000000e+00> : vector<1xf32>
      %155 = vector.multi_reduction <add>, %154, %cst_101 [1, 2] : vector<1x2x128xf32> to vector<1xf32>
      %156 = vector.shape_cast %155 : vector<1xf32> to vector<1x1x1xf32>
      %157 = vector.extract %156[0, 0, 0] : f32 from vector<1x1x1xf32>
      %c0_102 = arith.constant 0 : index
      %c4 = arith.constant 4 : index
      %158 = memref.load %arg13[%c0_102, %c4] : memref<1x6xf32, #tpu.memory_space<smem>>
      memref.store %157, %arg13[%c0_102, %c4] : memref<1x6xf32, #tpu.memory_space<smem>>
      %c0_103 = arith.constant 0 : index
      %c0_104 = arith.constant 0 : index
      %c0_105 = arith.constant 0 : index
      %159 = vector.load %arg12[%c0_103, %c0_104, %c0_105] : memref<3x2x128xf32, #tpu.memory_space<vmem>>, vector<1x2x128xf32>
      %160 = vector.shape_cast %159 : vector<1x2x128xf32> to vector<2x128xf32>
      %c1_106 = arith.constant 1 : index
      %c0_107 = arith.constant 0 : index
      %c0_108 = arith.constant 0 : index
      %161 = vector.load %arg12[%c1_106, %c0_107, %c0_108] : memref<3x2x128xf32, #tpu.memory_space<vmem>>, vector<1x2x128xf32>
      %162 = vector.shape_cast %161 : vector<1x2x128xf32> to vector<2x128xf32>
      %c2_109 = arith.constant 2 : index
      %c0_110 = arith.constant 0 : index
      %c0_111 = arith.constant 0 : index
      %163 = vector.load %arg12[%c2_109, %c0_110, %c0_111] : memref<3x2x128xf32, #tpu.memory_space<vmem>>, vector<1x2x128xf32>
      %164 = vector.shape_cast %163 : vector<1x2x128xf32> to vector<2x128xf32>
      %165 = arith.mulf %160, %160 : vector<2x128xf32>
      %166 = arith.mulf %162, %162 : vector<2x128xf32>
      %167 = arith.addf %165, %166 : vector<2x128xf32>
      %168 = arith.mulf %164, %164 : vector<2x128xf32>
      %169 = arith.addf %167, %168 : vector<2x128xf32>
      %170 = math.sqrt %169 : vector<2x128xf32>
      %cst_112 = arith.constant 1.000000e+00 : f32
      %171 = vector.broadcast %cst_112 : f32 to vector<2x128xf32>
      %172 = arith.subf %170, %171 : vector<2x128xf32>
      %173 = arith.mulf %172, %172 : vector<2x128xf32>
      %174 = vector.shape_cast %173 : vector<2x128xf32> to vector<1x2x128xf32>
      %cst_113 = arith.constant dense<0.000000e+00> : vector<1xf32>
      %175 = vector.multi_reduction <add>, %174, %cst_113 [1, 2] : vector<1x2x128xf32> to vector<1xf32>
      %176 = vector.shape_cast %175 : vector<1xf32> to vector<1x1x1xf32>
      %177 = vector.extract %176[0, 0, 0] : f32 from vector<1x1x1xf32>
      %c0_114 = arith.constant 0 : index
      %c5 = arith.constant 5 : index
      %178 = memref.load %arg13[%c0_114, %c5] : memref<1x6xf32, #tpu.memory_space<smem>>
      memref.store %177, %arg13[%c0_114, %c5] : memref<1x6xf32, #tpu.memory_space<smem>>
    } else {
    }
    return
  }
  func.func @transform_0(%arg0: i32, %arg1: i32) -> (i32, i32) {
    %c1_i32 = arith.constant 1 : i32
    %0 = arith.muli %arg0, %c1_i32 : i32
    %1 = arith.addi %0, %arg1 : i32
    %c0_i32 = arith.constant 0 : i32
    %c0_i32_0 = arith.constant 0 : i32
    return %1, %c0_i32 : i32, i32
  }
  func.func @transform_1(%arg0: i32, %arg1: i32) -> (i32, i32) {
    %c1_i32 = arith.constant 1 : i32
    %0 = arith.muli %arg0, %c1_i32 : i32
    %1 = arith.addi %0, %arg1 : i32
    %c0_i32 = arith.constant 0 : i32
    %c0_i32_0 = arith.constant 0 : i32
    return %1, %c0_i32 : i32, i32
  }
  func.func @transform_2(%arg0: i32, %arg1: i32) -> (i32, i32) {
    %c1_i32 = arith.constant 1 : i32
    %0 = arith.muli %arg0, %c1_i32 : i32
    %1 = arith.addi %0, %arg1 : i32
    %c0_i32 = arith.constant 0 : i32
    %c0_i32_0 = arith.constant 0 : i32
    return %1, %c0_i32 : i32, i32
  }
  func.func @transform_3(%arg0: i32, %arg1: i32) -> (i32, i32) {
    %c1_i32 = arith.constant 1 : i32
    %0 = arith.muli %arg0, %c1_i32 : i32
    %1 = arith.addi %0, %arg1 : i32
    %c0_i32 = arith.constant 0 : i32
    %c0_i32_0 = arith.constant 0 : i32
    return %1, %c0_i32 : i32, i32
  }
  func.func @transform_4(%arg0: i32, %arg1: i32) -> (i32, i32, i32) {
    %c1_i32 = arith.constant 1 : i32
    %0 = arith.muli %arg0, %c1_i32 : i32
    %1 = arith.addi %0, %arg1 : i32
    %c0_i32 = arith.constant 0 : i32
    %c0_i32_0 = arith.constant 0 : i32
    %c0_i32_1 = arith.constant 0 : i32
    return %c0_i32, %1, %c0_i32_0 : i32, i32, i32
  }
  func.func @transform_5(%arg0: i32, %arg1: i32) -> (i32, i32) {
    %c1_i32 = arith.constant 1 : i32
    %0 = arith.muli %arg0, %c1_i32 : i32
    %1 = arith.addi %0, %arg1 : i32
    %c0_i32 = arith.constant 0 : i32
    %c0_i32_0 = arith.constant 0 : i32
    return %1, %c0_i32 : i32, i32
  }
  func.func @transform_6(%arg0: i32, %arg1: i32) -> (i32, i32, i32) {
    %c1_i32 = arith.constant 1 : i32
    %0 = arith.muli %arg0, %c1_i32 : i32
    %1 = arith.addi %0, %arg1 : i32
    %c0_i32 = arith.constant 0 : i32
    %c0_i32_0 = arith.constant 0 : i32
    %c0_i32_1 = arith.constant 0 : i32
    return %c0_i32, %1, %c0_i32_0 : i32, i32, i32
  }
  func.func @transform_7(%arg0: i32, %arg1: i32) -> (i32, i32, i32) {
    %c1_i32 = arith.constant 1 : i32
    %0 = arith.muli %arg0, %c1_i32 : i32
    %1 = arith.addi %0, %arg1 : i32
    %c0_i32 = arith.constant 0 : i32
    %c0_i32_0 = arith.constant 0 : i32
    %c0_i32_1 = arith.constant 0 : i32
    return %c0_i32, %1, %c0_i32_0 : i32, i32, i32
  }
  func.func @transform_8(%arg0: i32, %arg1: i32) -> (i32, i32) {
    %c1_i32 = arith.constant 1 : i32
    %0 = arith.muli %arg0, %c1_i32 : i32
    %1 = arith.addi %0, %arg1 : i32
    %c0_i32 = arith.constant 0 : i32
    %c0_i32_0 = arith.constant 0 : i32
    return %1, %c0_i32 : i32, i32
  }
  func.func @transform_9(%arg0: i32, %arg1: i32) -> (i32, i32) {
    %c0_i32 = arith.constant 0 : i32
    %c0_i32_0 = arith.constant 0 : i32
    %c0_i32_1 = arith.constant 0 : i32
    return %c0_i32, %c0_i32_0 : i32, i32
  }
  func.func @transform_10(%arg0: i32, %arg1: i32) -> (i32, i32, i32) {
    %c0_i32 = arith.constant 0 : i32
    %c0_i32_0 = arith.constant 0 : i32
    %c0_i32_1 = arith.constant 0 : i32
    %c0_i32_2 = arith.constant 0 : i32
    return %c0_i32, %c0_i32_0, %c0_i32_1 : i32, i32, i32
  }
  func.func @transform_11(%arg0: i32, %arg1: i32) -> (i32, i32) {
    %c0_i32 = arith.constant 0 : i32
    %c0_i32_0 = arith.constant 0 : i32
    return %arg0, %c0_i32 : i32, i32
  }
}

</mosaic_0001>

<bundles_post_ra>
// kernel: pegasus_loss.1
= control target key start
LH: loop header
LB: loop body
LE: loop exit
PB: predicated region body
PF: predicated region fallthrough
CT: control target
= control target key end

     0   :  { %s2272_s0 = inlined_call_operand.vmem [shape: f32[64,128], index: 0, kind: input, shape index: {}]   ;;  %s2273_s1 = inlined_call_operand.vmem [shape: f32[64,128], index: 1, kind: input, shape index: {}]   ;;  %s2274_s2 = inlined_call_operand.vmem [shape: f32[192,128], index: 2, kind: input, shape index: {}]   ;;  %s2275_s3 = inlined_call_operand.vmem [shape: f32[192,128], index: 3, kind: input, shape index: {}]   ;;  %s2276_s4 = inlined_call_operand.vmem [shape: f32[3,64,128], index: 4, kind: input, shape index: {}]   ;;  %s2277_s5 = inlined_call_operand.vmem [shape: f32[64,128], index: 5, kind: input, shape index: {}]   ;;  %s2278_s6 = inlined_call_operand.vmem [shape: f32[3,64,128], index: 6, kind: input, shape index: {}]   ;;  %s2279_s7 = inlined_call_operand.vmem [shape: f32[3,64,128], index: 7, kind: input, shape index: {}]   ;;  %s2280_s8 = inlined_call_operand.vmem [shape: f32[64,128], index: 8, kind: input, shape index: {}]   ;;  %s2281_s9 = inlined_call_operand.vmem [shape: f32[2,128], index: 9, kind: input, shape index: {}]   ;;  %s2282_s10 = inlined_call_operand.vmem [shape: f32[3,2,128], index: 10, kind: input, shape index: {}]   ;;  %s2283_s11 = inlined_call_operand.vmem [shape: f32[1,6], index: 11, kind: output, shape index: {}]  }
   0x1   :  { %v1277_v0 = vld [vmem:[%s2273_s1] sm:$0xff]  ;;  %v1282_v1 = vld [vmem:[%s2273_s1 + $0x8] sm:$0xff]  ;;  %v1287_v2 = vld [vmem:[%s2273_s1 + $0x10] sm:$0xff] }
   0x2   :  { %2309 = vst [vmem:[#allocation6_spill] sm:$0xff] %v1277_v0  ;;  %2310 = vst [vmem:[#allocation7_spill] sm:$0xff] %v1282_v1  ;;  %v1292_v3 = vld [vmem:[%s2273_s1 + $0x18] sm:$0xff]  ;;  %v1297_v4 = vld [vmem:[%s2273_s1 + $0x20] sm:$0xff]  ;;  %v434_v19 = vsub.f32 1.0, %v1277_v0  ;;  %v435_v24 = vsub.f32 1.0, %v1282_v1 }
   0x3   :  { %2311 = vst [vmem:[#allocation8_spill] sm:$0xff] %v1287_v2  ;;  %2312 = vst [vmem:[#allocation9_spill] sm:$0xff] %v1292_v3  ;;  %v1302_v5 = vld [vmem:[%s2273_s1 + $0x28] sm:$0xff]  ;;  %v1307_v6 = vld [vmem:[%s2273_s1 + $0x30] sm:$0xff]  ;;  %v436_v26 = vsub.f32 1.0, %v1287_v2  ;;  %v437_v27 = vsub.f32 1.0, %v1292_v3 }
   0x4   :  { %2313 = vst [vmem:[#allocation10_spill] sm:$0xff] %v1297_v4  ;;  %2314 = vst [vmem:[#allocation11_spill] sm:$0xff] %v1302_v5  ;;  %v1312_v7 = vld [vmem:[%s2273_s1 + $0x38] sm:$0xff]  ;;  %v1317_v8 = vld [vmem:[%s2277_s5] sm:$0xff]  ;;  %v438_v28 = vsub.f32 1.0, %v1297_v4  ;;  %v439_v30 = vsub.f32 1.0, %v1302_v5 }
   0x5   :  { %2315 = vst [vmem:[#allocation12_spill] sm:$0xff] %v1307_v6  ;;  %2316 = vst [vmem:[#allocation13_spill] sm:$0xff] %v1312_v7  ;;  %v1322_v9 = vld [vmem:[%s2277_s5 + $0x8] sm:$0xff]  ;;  %v1327_v10 = vld [vmem:[%s2277_s5 + $0x10] sm:$0xff]  ;;  %v1336_v12 = vmul.f32 %v1317_v8, %v1277_v0  ;;  %v440_v31 = vsub.f32 1.0, %v1307_v6  ;;  %v441_v32 = vsub.f32 1.0, %v1312_v7 }
   0x6   :  { %2317 = vst [vmem:[#allocation14_spill] sm:$0xff] %v1317_v8  ;;  %2318 = vst [vmem:[#allocation15_spill] sm:$0xff] %v1322_v9  ;;  %v1332_v11 = vld [vmem:[%s2277_s5 + $0x18] sm:$0xff]  ;;  %v1341_v13 = vld [vmem:[%s2277_s5 + $0x20] sm:$0xff]  ;;  %v1355_v16 = vmul.f32 %v1322_v9, %v1282_v1  ;;  %v1359_v17 = vmul.f32 %v1327_v10, %v1287_v2 }
   0x7   :  { %2319 = vst [vmem:[#allocation16_spill] sm:$0xff] %v1327_v10  ;;  %2320 = vst [vmem:[#allocation17_spill] sm:$0xff] %v1332_v11  ;;  %v1346_v14 = vld [vmem:[%s2277_s5 + $0x28] sm:$0xff]  ;;  %v1351_v15 = vld [vmem:[%s2277_s5 + $0x30] sm:$0xff]  ;;  %v1363_v18 = vmul.f32 %v1332_v11, %v1292_v3  ;;  %v1373_v21 = vmul.f32 %v1341_v13, %v1297_v4  ;;  %v1393_v29 = vsub.f32 %v1277_v0, %v1336_v12  ;;  %v1469_v54 = vsub.f32 1.0, %v1336_v12 }
   0x8   :  { %2321 = vst [vmem:[#allocation18_spill] sm:$0xff] %v1341_v13  ;;  %2322 = vst [vmem:[#allocation19_spill] sm:$0xff] %v1346_v14  ;;  %v1369_v20 = vld [vmem:[%s2277_s5 + $0x38] sm:$0xff]  ;;  %v1377_v22 = vmul.f32 %v1346_v14, %v1302_v5  ;;  %v1381_v23 = vmul.f32 %v1351_v15, %v1307_v6  ;;  %v1400_v33 = vsub.f32 %v1282_v1, %v1355_v16  ;;  %v458_v37 = vld [vmem:[%s2276_s4] sm:$0xff]  ;;  %v1484_v61 = vsub.f32 1.0, %v1355_v16 }
   0x9   :  { %2323 = vst [vmem:[#allocation20_spill] sm:$0xff] %v1351_v15  ;;  %2324 = vst [vmem:[#allocation21_spill] sm:$0xff] %v1369_v20  ;;  %v1386_v25 = vmul.f32 %v1369_v20, %v1312_v7  ;;  %v1404_v34 = vsub.f32 %v1287_v2, %v1359_v17  ;;  %v1408_v35 = vsub.f32 %v1292_v3, %v1363_v18  ;;  %v459_v42 = vld [vmem:[%s2276_s4 + $0x8] sm:$0xff]  ;;  %v460_v43 = vld [vmem:[%s2276_s4 + $0x10] sm:$0xff]  ;;  %v1487_v62 = vsub.f32 1.0, %v1359_v17 }
   0xa   :  { %2325 = vst [vmem:[#allocation22_spill] sm:$0xff] %v1400_v33  ;;  %v1412_v36 = vsub.f32 %v1297_v4, %v1373_v21  ;;  %v1419_v38 = vsub.f32 %v1302_v5, %v1377_v22  ;;  %v1423_v39 = vsub.f32 %v1307_v6, %v1381_v23  ;;  %v1430_v41 = vadd.f32 %v434_v19, %v1336_v12  ;;  %v461_v44 = vld [vmem:[%s2276_s4 + $0x18] sm:$0xff]  ;;  %v462_v49 = vld [vmem:[%s2276_s4 + $0x20] sm:$0xff]  ;;  %v463_v50 = vld [vmem:[%s2276_s4 + $0x28] sm:$0xff] }
   0xb   :  { %2326 = vst [vmem:[#allocation23_spill] sm:$0xff] %v1404_v34  ;;  %2327 = vst [vmem:[#allocation24_spill] sm:$0xff] %v1408_v35  ;;  %v1427_v40 = vsub.f32 %v1312_v7, %v1386_v25  ;;  %v1442_v45 = vadd.f32 %v435_v24, %v1355_v16  ;;  %v1445_v46 = vadd.f32 %v436_v26, %v1359_v17  ;;  %v464_v55 = vld [vmem:[%s2276_s4 + $0x30] sm:$0xff]  ;;  %v1477_v56 = vld [vmem:[%s2276_s4 + $0x38] sm:$0xff]  ;;  %v1508_v15 = vsub.f32 1.0, %v1363_v18 }
   0xc   :  { %2328 = vst [vmem:[#allocation25_spill] sm:$0xff] %v1419_v38  ;;  %2330 = vst [vmem:[#allocation27_spill] sm:$0xff] %v1430_v41  ;;  %v1448_v47 = vadd.f32 %v437_v27, %v1363_v18  ;;  %v1451_v48 = vadd.f32 %v438_v28, %v1373_v21  ;;  %v1460_v51 = vadd.f32 %v439_v30, %v1377_v22  ;;  %v482_v24 = vld [vmem:[%s2278_s6] sm:$0xff]  ;;  %v483_v26 = vld [vmem:[%s2278_s6 + $0x8] sm:$0xff]  ;;  %v1519_v9 = vsub.f32 1.0, %v1377_v22 }
   0xd   :  { %2329 = vst [vmem:[#allocation26_spill] sm:$0xff] %v1427_v40  ;;  %2331 = vst [vmem:[#allocation28_spill] sm:$0xff] %v1442_v45  ;;  %v1463_v52 = vadd.f32 %v440_v31, %v1381_v23  ;;  %v1466_v53 = vadd.f32 %v441_v32, %v1386_v25  ;;  %v466_v57 = vmul.f32 %v458_v37, %v1393_v29  ;;  %v484_v27 = vld [vmem:[%s2278_s6 + $0x10] sm:$0xff]  ;;  %v485_v20 = vld [vmem:[%s2278_s6 + $0x18] sm:$0xff]  ;;  %v1522_v8 = vsub.f32 1.0, %v1381_v23 }
   0xe   :  { %2332 = vst [vmem:[#allocation29_spill] sm:$0xff] %v1445_v46  ;;  %2333 = vst [vmem:[#allocation30_spill] sm:$0xff] %v1448_v47  ;;  %v467_v58 = vmul.f32 %v459_v42, %v1400_v33  ;;  %v468_v59 = vmul.f32 %v460_v43, %v1404_v34  ;;  %v469_v60 = vmul.f32 %v461_v44, %v1408_v35  ;;  %v486_v7 = vld [vmem:[%s2278_s6 + $0x20] sm:$0xff]  ;;  %v488_v4 = vld [vmem:[%s2278_s6 + $0x30] sm:$0xff] }
   0xf   :  { %v470_v63 = vmul.f32 %v462_v49, %v1412_v36  ;;  %v471_v19 = vmul.f32 %v463_v50, %v1419_v38  ;;  %v474_v28 = vadd.f32 %v466_v57, %v1430_v41  ;;  %v472_v14 = vmul.f32 %v464_v55, %v1423_v39  ;;  %v1109_v1 = vld [vmem:[%s2278_s6 + $0x40] sm:$0xff]  ;;  %v1110_v0 = vld [vmem:[%s2278_s6 + $0x48] sm:$0xff] }
  0x10   :  { %v475_v30 = vadd.f32 %v467_v58, %v1442_v45  ;;  %v476_v31 = vadd.f32 %v468_v59, %v1445_v46  ;;  %v477_v32 = vadd.f32 %v469_v60, %v1448_v47  ;;  %v473_v13 = vmul.f32 %v1477_v56, %v1427_v40 }
  0x11   :  { %v478_v57 = vadd.f32 %v470_v63, %v1451_v48  ;;  %v479_v58 = vadd.f32 %v471_v19, %v1460_v51  ;;  %v490_v11 = vsub.f32 %v474_v28, %v482_v24  ;;  %v1516_v60 = vsub.f32 1.0, %v1373_v21  ;;  %v487_v63 = vld [vmem:[%s2278_s6 + $0x28] sm:$0xff] }
  0x12   :  { %v491_v59 = vsub.f32 %v475_v30, %v483_v26  ;;  %v492_v10 = vsub.f32 %v476_v31, %v484_v27  ;;  %v493_v19 = vsub.f32 %v477_v32, %v485_v20  ;;  %v514_v28 = vmul.f32 %v458_v37, %v1336_v12  ;;  %v489_v37 = vld [vmem:[%s2278_s6 + $0x38] sm:$0xff] }
  0x13   :  { %v498_v24 = vand.u32 2147483647, %v490_v11  ;;  %v1532_v30 = vsub.f32 1.0, %v1386_v25  ;;  %v480_v31 = vadd.f32 %v472_v14, %v1463_v52  ;;  %v481_v6 = vadd.f32 %v473_v13, %v1466_v53 }
  0x14   :  { %v499_v26 = vand.u32 2147483647, %v491_v59  ;;  %v500_v27 = vand.u32 2147483647, %v492_v10  ;;  %v515_v5 = vmul.f32 %v459_v42, %v1355_v16  ;;  %v494_v3 = vsub.f32 %v478_v57, %v486_v7  ;;  %v530_v59 = vld [vmem:[%s2279_s7] sm:$0xff] }
  0x15   :  { %v495_v20 = vsub.f32 %v479_v58, %v487_v63  ;;  %v516_v10 = vmul.f32 %v460_v43, %v1359_v17  ;;  %v501_v32 = vand.u32 2147483647, %v493_v19  ;;  %v517_v14 = vmul.f32 %v461_v44, %v1363_v18  ;;  %v531_v63 = vld [vmem:[%s2279_s7 + $0x8] sm:$0xff]  ;;  %v532_v44 = vld [vmem:[%s2279_s7 + $0x10] sm:$0xff] }
  0x16   :  { %v506_v11 = vadd.f32 %v499_v26, %v498_v24  ;;  %v518_v13 = vmul.f32 %v462_v49, %v1373_v21  ;;  %v519_v42 = vmul.f32 %v463_v50, %v1377_v22  ;;  %v520_v57 = vmul.f32 %v464_v55, %v1381_v23  ;;  %v533_v49 = vld [vmem:[%s2279_s7 + $0x18] sm:$0xff] }
  0x17   :  { %v522_v43 = vadd.f32 %v514_v28, %v1469_v54  ;;  %v523_v58 = vadd.f32 %v515_v5, %v1484_v61  ;;  %v496_v50 = vsub.f32 %v480_v31, %v488_v4  ;;  %v524_v19 = vadd.f32 %v516_v10, %v1487_v62  ;;  %v534_v28 = vld [vmem:[%s2279_s7 + $0x20] sm:$0xff]  ;;  %v535_v4 = vld [vmem:[%s2279_s7 + $0x28] sm:$0xff] }
  0x18   :  { %v507_v7 = vadd.f32 %v506_v11, %v500_v27  ;;  %v525_v55 = vadd.f32 %v517_v14, %v1508_v15  ;;  %v526_v24 = vadd.f32 %v518_v13, %v1516_v60  ;;  %v497_v5 = vsub.f32 %v481_v6, %v489_v37  ;;  %v1581_v6 = vld [vmem:[%s2276_s4 + $0x48] sm:$0xff]  ;;  %v1588_v13 = vld [vmem:[%s2276_s4 + $0x50] sm:$0xff] }
  0x19   :  { %v502_v26 = vand.u32 2147483647, %v494_v3  ;;  %v521_v27 = vmul.f32 %v1477_v56, %v1386_v25  ;;  %v538_v11 = vsub.f32 %v522_v43, %v530_v59  ;;  %v539_v31 = vsub.f32 %v523_v58, %v531_v63  ;;  %v1576_v3 = vld [vmem:[%s2276_s4 + $0x40] sm:$0xff]  ;;  %v1593_v59 = vld [vmem:[%s2276_s4 + $0x58] sm:$0xff] }
  0x1a   :  { %v508_v2 = vadd.f32 %v507_v7, %v501_v32  ;;  %v540_v10 = vsub.f32 %v524_v19, %v532_v44  ;;  %v541_v14 = vsub.f32 %v525_v55, %v533_v49  ;;  %v503_v56 = vand.u32 2147483647, %v495_v20  ;;  %v1598_v7 = vld [vmem:[%s2276_s4 + $0x60] sm:$0xff]  ;;  %v536_v49 = vld [vmem:[%s2279_s7 + $0x30] sm:$0xff]  ;;  %v1609_v19 = vld [vmem:[%s2276_s4 + $0x68] sm:$0xff] }
  0x1b   :  { %v527_v37 = vadd.f32 %v519_v42, %v1519_v9  ;;  %v528_v32 = vadd.f32 %v520_v57, %v1522_v8  ;;  %v542_v20 = vsub.f32 %v526_v24, %v534_v28  ;;  %v546_v43 = vand.u32 2147483647, %v538_v11 }
  0x1c   :  { %v547_v42 = vand.u32 2147483647, %v539_v31  ;;  %v548_v58 = vand.u32 2147483647, %v540_v10  ;;  %v504_v57 = vand.u32 2147483647, %v496_v50  ;;  %v529_v44 = vadd.f32 %v521_v27, %v1532_v30 }
  0x1d   :  { %v1600_v63 = vand.u32 2147483647, %v497_v5  ;;  %v571_v55 = vmul.f32 %v1576_v3, %v1393_v29  ;;  %v509_v24 = vadd.f32 %v508_v2, %v502_v26  ;;  %v537_v50 = vld [vmem:[%s2279_s7 + $0x38] sm:$0xff]  ;;  %v549_v5 = vand.u32 2147483647, %v541_v14  ;;  %v1621_v31 = vld [vmem:[%s2276_s4 + $0x70] sm:$0xff] }
  0x1e   :  { %v554_v28 = vadd.f32 %v547_v42, %v546_v43  ;;  %v572_v27 = vmul.f32 %v1581_v6, %v1400_v33  ;;  %v543_v11 = vsub.f32 %v527_v37, %v535_v4  ;;  %v1626_v10 = vld [vmem:[%s2276_s4 + $0x78] sm:$0xff]  ;;  %v573_v2 = vmul.f32 %v1588_v13, %v1404_v34 }
  0x1f   :  { %v574_v26 = vmul.f32 %v1593_v59, %v1408_v35  ;;  %v575_v14 = vmul.f32 %v1598_v7, %v1412_v36  ;;  %v544_v4 = vsub.f32 %v528_v32, %v536_v49  ;;  %v550_v37 = vand.u32 2147483647, %v542_v20  ;;  %v1111_v20 = vld [vmem:[%s2278_s6 + $0x50] sm:$0xff] }
  0x20   :  { %v555_v43 = vadd.f32 %v554_v28, %v548_v58  ;;  %v576_v42 = vmul.f32 %v1609_v19, %v1419_v38  ;;  %v545_v34 = vsub.f32 %v529_v44, %v537_v50  ;;  %v579_v35 = vadd.f32 %v571_v55, %v1430_v41  ;;  %v1112_v44 = vld [vmem:[%s2278_s6 + $0x58] sm:$0xff] }
  0x21   :  { %v580_v33 = vadd.f32 %v572_v27, %v1442_v45  ;;  %v581_v32 = vadd.f32 %v573_v2, %v1445_v46  ;;  %v577_v49 = vmul.f32 %v1621_v31, %v1423_v39  ;;  %v578_v28 = vmul.f32 %v1626_v10, %v1427_v40 }
  0x22   :  { %v556_v58 = vadd.f32 %v555_v43, %v549_v5  ;;  %v582_v38 = vadd.f32 %v574_v26, %v1448_v47  ;;  %v510_v55 = vadd.f32 %v509_v24, %v503_v56  ;;  %v583_v50 = vadd.f32 %v575_v14, %v1451_v48  ;;  %v1113_v43 = vld [vmem:[%s2278_s6 + $0x60] sm:$0xff]  ;;  %v1114_v26 = vld [vmem:[%s2278_s6 + $0x68] sm:$0xff]  ;;  %v1115_v14 = vld [vmem:[%s2278_s6 + $0x70] sm:$0xff] }
  0x23   :  { %v596_v27 = vsub.f32 %v579_v35, %v1109_v1  ;;  %v597_v2 = vsub.f32 %v580_v33, %v1110_v0  ;;  %v551_v46 = vand.u32 2147483647, %v543_v11  ;;  %v584_v5 = vadd.f32 %v576_v42, %v1460_v51 }
  0x24   :  { %v557_v45 = vadd.f32 %v556_v58, %v550_v37  ;;  %v598_v40 = vsub.f32 %v581_v32, %v1111_v20  ;;  %v552_v41 = vand.u32 2147483647, %v544_v4  ;;  %v599_v47 = vsub.f32 %v582_v38, %v1112_v44  ;;  %v1116_v4 = vld [vmem:[%s2278_s6 + $0x78] sm:$0xff] }
  0x25   :  { %v604_v56 = vand.u32 2147483647, %v596_v27  ;;  %v585_v24 = vadd.f32 %v577_v49, %v1463_v52  ;;  %v586_v0 = vadd.f32 %v578_v28, %v1466_v53  ;;  %v605_v1 = vand.u32 2147483647, %v597_v2 }
  0x26   :  { %v606_v33 = vand.u32 2147483647, %v598_v40  ;;  %v511_v35 = vadd.f32 %v510_v55, %v504_v57  ;;  %v553_v11 = vand.u32 2147483647, %v545_v34  ;;  %v600_v37 = vsub.f32 %v583_v50, %v1113_v43 }
  0x27   :  { %v620_v38 = vmul.f32 %v1576_v3, %v1336_v12  ;;  %v558_v42 = vadd.f32 %v557_v45, %v551_v46  ;;  %v601_v32 = vsub.f32 %v584_v5, %v1114_v26  ;;  %v612_v20 = vadd.f32 %v605_v1, %v604_v56  ;;  %v1117_v46 = vld [vmem:[%s2279_s7 + $0x40] sm:$0xff] }
  0x28   :  { %v621_v40 = vmul.f32 %v1581_v6, %v1355_v16  ;;  %v607_v57 = vand.u32 2147483647, %v599_v47  ;;  %v622_v34 = vmul.f32 %v1588_v13, %v1359_v17  ;;  %v623_v58 = vmul.f32 %v1593_v59, %v1363_v18  ;;  %v1118_v47 = vld [vmem:[%s2279_s7 + $0x48] sm:$0xff]  ;;  %v1121_v56 = vld [vmem:[%s2279_s7 + $0x60] sm:$0xff] }
  0x29   :  { %v624_v49 = vmul.f32 %v1598_v7, %v1373_v21  ;;  %v602_v28 = vsub.f32 %v585_v24, %v1115_v14  ;;  %v603_v44 = vsub.f32 %v586_v0, %v1116_v4  ;;  %v613_v55 = vadd.f32 %v612_v20, %v606_v33  ;;  %v1119_v7 = vld [vmem:[%s2279_s7 + $0x50] sm:$0xff]  ;;  %v1711_v24 = vld [vmem:[%s2279_s7 + $0x68] sm:$0xff] }
  0x2a   :  { %v625_v45 = vmul.f32 %v1609_v19, %v1377_v22  ;;  %v628_v3 = vadd.f32 %v620_v38, %v1469_v54  ;;  %v629_v6 = vadd.f32 %v621_v40, %v1484_v61  ;;  %v630_v13 = vadd.f32 %v622_v34, %v1487_v62  ;;  %v1120_v19 = vld [vmem:[%s2279_s7 + $0x58] sm:$0xff]  ;;  %v1722_v4 = vld [vmem:[%s2276_s4 + $0x88] sm:$0xff] }
  0x2b   :  { %v631_v59 = vadd.f32 %v623_v58, %v1508_v15  ;;  %v559_v50 = vadd.f32 %v558_v42, %v552_v41  ;;  %v608_v27 = vand.u32 2147483647, %v600_v37  ;;  %v626_v2 = vmul.f32 %v1621_v31, %v1381_v23  ;;  %v1716_v31 = vld [vmem:[%s2276_s4 + $0x80] sm:$0xff]  ;;  %v1727_v37 = vld [vmem:[%s2276_s4 + $0x90] sm:$0xff]  ;;  %v1732_v38 = vld [vmem:[%s2276_s4 + $0x98] sm:$0xff] }
  0x2c   :  { %v632_v5 = vadd.f32 %v624_v49, %v1516_v60  ;;  %v614_v43 = vadd.f32 %v613_v55, %v607_v57  ;;  %v627_v26 = vmul.f32 %v1626_v10, %v1386_v25  ;;  %v645_v41 = vsub.f32 %v628_v3, %v1117_v46  ;;  %v1741_v55 = vld [vmem:[%s2276_s4 + $0xa0] sm:$0xff]  ;;  %v1755_v46 = vld [vmem:[%s2276_s4 + $0xb0] sm:$0xff] }
  0x2d   :  { %v646_v0 = vsub.f32 %v629_v6, %v1118_v47  ;;  %v609_v1 = vand.u32 2147483647, %v601_v32  ;;  %v633_v33 = vadd.f32 %v625_v45, %v1519_v9  ;;  %v647_v10 = vsub.f32 %v630_v13, %v1119_v7  ;;  %v1746_v45 = vld [vmem:[%s2276_s4 + $0xa8] sm:$0xff]  ;;  %v1124_v7 = vld [vmem:[%s2279_s7 + $0x78] sm:$0xff] }
  0x2e   :  { %v648_v14 = vsub.f32 %v631_v59, %v1120_v19  ;;  %v512_v42 = vadd.f32 %v511_v35, %v1600_v63  ;;  %v610_v32 = vand.u32 2147483647, %v602_v28  ;;  %v1735_v20 = vand.u32 2147483647, %v603_v44  ;;  %v1123_v44 = vld [vmem:[%s2279_s7 + $0x70] sm:$0xff]  ;;  %v2335_v19 = vld [vmem:[#allocation23_spill] sm:$0xff] }
  0x2f   :  { %v653_v40 = vand.u32 2147483647, %v645_v41  ;;  %v634_v57 = vadd.f32 %v626_v2, %v1522_v8  ;;  %v649_v34 = vsub.f32 %v632_v5, %v1121_v56  ;;  %v654_v58 = vand.u32 2147483647, %v646_v0  ;;  %v2337_v5 = vld [vmem:[#allocation25_spill] sm:$0xff] }
  0x30   :  { %v655_v49 = vand.u32 2147483647, %v647_v10  ;;  %v560_v63 = vadd.f32 %v559_v50, %v553_v11  ;;  %v615_v35 = vadd.f32 %v614_v43, %v608_v27  ;;  %v635_v28 = vadd.f32 %v627_v26, %v1532_v30  ;;  %v2334_v11 = vld [vmem:[#allocation22_spill] sm:$0xff]  ;;  %v2336_v27 = vld [vmem:[#allocation24_spill] sm:$0xff]  ;;  %v1776_v41 = vld [vmem:[%s2276_s4 + $0xb8] sm:$0xff] }
  0x31   :  { %v678_v47 = vmul.f32 %v1716_v31, %v1393_v29  ;;  %v650_v3 = vsub.f32 %v633_v33, %v1711_v24  ;;  %v656_v6 = vand.u32 2147483647, %v648_v14  ;;  %v661_v13 = vadd.f32 %v654_v58, %v653_v40  ;;  %v1133_v33 = vld [vmem:[%s2278_s6 + $0x80] sm:$0xff]  ;;  %v2338_v10 = vld [vmem:[#allocation27_spill] sm:$0xff]  ;;  %v2339_v40 = vld [vmem:[#allocation28_spill] sm:$0xff] }
  0x32   :  { %v679_v59 = vmul.f32 %v1722_v4, %v2334_v11  ;;  %v680_v50 = vmul.f32 %v1727_v37, %v2335_v19  ;;  %v681_v2 = vmul.f32 %v1732_v38, %v2336_v27  ;;  %v682_v29 = vmul.f32 %v1741_v55, %v1412_v36  ;;  %v1134_v36 = vld [vmem:[%s2278_s6 + $0x88] sm:$0xff] }
  0x33   :  { %v683_v43 = vmul.f32 %v1746_v45, %v2337_v5  ;;  %v651_v26 = vsub.f32 %v634_v57, %v1123_v44  ;;  %v657_v56 = vand.u32 2147483647, %v649_v34  ;;  %v662_v24 = vadd.f32 %v661_v13, %v655_v49  ;;  %v2340_v34 = vld [vmem:[#allocation29_spill] sm:$0xff]  ;;  %v2341_v49 = vld [vmem:[#allocation30_spill] sm:$0xff] }
  0x34   :  { %v684_v0 = vmul.f32 %v1755_v46, %v1423_v39  ;;  %v686_v14 = vadd.f32 %v678_v47, %v2338_v10  ;;  %v687_v57 = vadd.f32 %v679_v59, %v2339_v40  ;;  %v688_v58 = vadd.f32 %v680_v50, %v2340_v34  ;;  %v1135_v39 = vld [vmem:[%s2278_s6 + $0x90] sm:$0xff]  ;;  %v1136_v13 = vld [vmem:[%s2278_s6 + $0x98] sm:$0xff]  ;;  %v2342_v47 = vld [vmem:[#allocation26_spill] sm:$0xff] }
  0x35   :  { %v689_v44 = vadd.f32 %v681_v2, %v2341_v49  ;;  %v616_v11 = vadd.f32 %v615_v35, %v609_v1  ;;  %v652_v19 = vsub.f32 %v635_v28, %v1124_v7  ;;  %v663_v27 = vadd.f32 %v662_v24, %v656_v6  ;;  %v1137_v2 = vld [vmem:[%s2278_s6 + $0xa0] sm:$0xff]  ;;  %v1138_v1 = vld [vmem:[%s2278_s6 + $0xa8] sm:$0xff] }
  0x36   :  { %v690_v5 = vadd.f32 %v682_v29, %v1451_v48  ;;  %v685_v59 = vmul.f32 %v1776_v41, %v2342_v47  ;;  %v691_v50 = vadd.f32 %v683_v43, %v1460_v51  ;;  %v703_v10 = vsub.f32 %v686_v14, %v1133_v33  ;;  %v1139_v48 = vld [vmem:[%s2278_s6 + $0xb0] sm:$0xff] }
  0x37   :  { %v704_v40 = vsub.f32 %v687_v57, %v1134_v36  ;;  %v1803_v34 = vadd.f32 %v560_v63, %v512_v42  ;;  %v692_v49 = vadd.f32 %v684_v0, %v1463_v52  ;;  %v705_v35 = vsub.f32 %v688_v58, %v1135_v39 }
  0x38   :  { %v706_v51 = vsub.f32 %v689_v44, %v1136_v13  ;;  %v658_v28 = vand.u32 2147483647, %v650_v3  ;;  %v659_v6 = vand.u32 2147483647, %v651_v26  ;;  %v664_v7 = vadd.f32 %v663_v27, %v657_v56 }
  0x39   :  { %v711_v29 = vand.u32 2147483647, %v703_v10  ;;  %v617_v43 = vadd.f32 %v616_v11, %v610_v32  ;;  %v707_v24 = vsub.f32 %v690_v5, %v1137_v2  ;;  %v712_v42 = vand.u32 2147483647, %v704_v40 }
  0x3a   :  { %v713_v63 = vand.u32 2147483647, %v705_v35  ;;  %v660_v33 = vand.u32 2147483647, %v652_v19  ;;  %v693_v52 = vadd.f32 %v685_v59, %v1466_v53  ;;  %v708_v0 = vsub.f32 %v691_v50, %v1138_v1 }
  0x3b   :  { %v727_v36 = vmul.f32 %v1716_v31, %v1336_v12  ;;  %v709_v14 = vsub.f32 %v692_v49, %v1139_v48  ;;  %v714_v57 = vand.u32 2147483647, %v706_v51  ;;  %v719_v47 = vadd.f32 %v712_v42, %v711_v29  ;;  %v1140_v12 = vld [vmem:[%s2278_s6 + $0xb8] sm:$0xff] }
  0x3c   :  { %v728_v3 = vmul.f32 %v1722_v4, %v1355_v16  ;;  %v665_v26 = vadd.f32 %v664_v7, %v658_v28  ;;  %v729_v32 = vmul.f32 %v1727_v37, %v1359_v17  ;;  %v730_v56 = vmul.f32 %v1732_v38, %v1363_v18  ;;  %v1141_v17 = vld [vmem:[%s2279_s7 + $0x80] sm:$0xff]  ;;  %v1142_v18 = vld [vmem:[%s2279_s7 + $0x88] sm:$0xff] }
  0x3d   :  { %v731_v53 = vmul.f32 %v1741_v55, %v1373_v21  ;;  %v715_v31 = vand.u32 2147483647, %v707_v24  ;;  %v720_v58 = vadd.f32 %v719_v47, %v713_v63  ;;  %v732_v44 = vmul.f32 %v1746_v45, %v1377_v22  ;;  %v1143_v22 = vld [vmem:[%s2279_s7 + $0x90] sm:$0xff] }
  0x3e   :  { %v733_v16 = vmul.f32 %v1755_v46, %v1381_v23  ;;  %v735_v21 = vadd.f32 %v727_v36, %v1469_v54  ;;  %v736_v4 = vadd.f32 %v728_v3, %v1484_v61  ;;  %v737_v37 = vadd.f32 %v729_v32, %v1487_v62  ;;  %v1144_v23 = vld [vmem:[%s2279_s7 + $0x98] sm:$0xff] }
  0x3f   :  { %v738_v38 = vadd.f32 %v730_v56, %v1508_v15  ;;  %v618_v55 = vadd.f32 %v617_v43, %v1735_v20  ;;  %v716_v45 = vand.u32 2147483647, %v708_v0  ;;  %v721_v46 = vadd.f32 %v720_v58, %v714_v57 }
  0x40   :  { %v739_v54 = vadd.f32 %v731_v53, %v1516_v60 }
  0x41   :  { %16 = vsyncpa [#allocation4], 0  ;;  %v710_v61 = vsub.f32 %v693_v52, %v1140_v12  ;;  %v734_v62 = vmul.f32 %v1776_v41, %v1386_v25  ;;  %v1145_v15 = vld [vmem:[%s2279_s7 + $0xa0] sm:$0xff]  ;;  %v752_v39 = vsub.f32 %v735_v21, %v1141_v17  ;;  %v753_v13 = vsub.f32 %v736_v4, %v1142_v18  ;;  %v1146_v25 = vld [vmem:[%s2279_s7 + $0xa8] sm:$0xff]  ;;  %s1038_s28 = sshll.u32 %s2283_s11, 4  ;;  %s1039_s28 = int_to_ptr.vmem [resolvable:$true] %s1038_s28 }
  0x42   :  { %v722_v11 = vadd.f32 %v721_v46, %v715_v31  ;;  %v740_v19 = vadd.f32 %v732_v44, %v1519_v9  ;;  %v754_v27 = vsub.f32 %v737_v37, %v1143_v22  ;;  %v755_v20 = vsub.f32 %v738_v38, %v1144_v23  ;;  %v262_v60 = vld [vmem:[%s2272_s0] sm:$0xff]  ;;  %v263_v2 = vld [vmem:[%s2272_s0 + $0x8] sm:$0xff]  ;;  %v264_v1 = vld [vmem:[%s2272_s0 + $0x10] sm:$0xff]  ;;  %s1199_s12 = scalar_lea.vmem %s1039_s28, 16  ;;  %p1204_p1 = scmp.lt.s32.totalorder %s1039_s28, %s1039_s28 }
  0x43   :  { %v666_v5 = vadd.f32 %v665_v26, %v659_v6  ;;  %v717_v59 = vand.u32 2147483647, %v709_v14  ;;  %v741_v50 = vadd.f32 %v733_v16, %v1522_v8  ;;  %v760_v41 = vand.u32 2147483647, %v752_v39  ;;  %v265_v8 = vld [vmem:[%s2272_s0 + $0x18] sm:$0xff]  ;;  %v1147_v51 = vld [vmem:[%s2279_s7 + $0xb0] sm:$0xff]  ;;  %p1200_p0 = scmp.ne.s32.totalorder %s1039_s28, %s1199_s12  ;;  %p1205_p2 = scmp.lt.s32.totalorder %s1199_s12, %s1199_s12 }
  0x44   :  { %v723_v9 = vadd.f32 %v722_v11, %v716_v45  ;;  %v756_v10 = vsub.f32 %v739_v54, %v1145_v15  ;;  %v761_v40 = vand.u32 2147483647, %v753_v13  ;;  %v762_v49 = vand.u32 2147483647, %v754_v27  ;;  %v2343_v28 = vld [vmem:[#allocation6_spill] sm:$0xff]  ;;  %v2344_v42 = vld [vmem:[#allocation7_spill] sm:$0xff] }
  0x45   :  { %v619_v48 = vadd.f32 %v618_v55, %v1803_v34  ;;  %v742_v35 = vadd.f32 %v734_v62, %v1532_v30  ;;  %v270_v6 = vsub.f32 %v262_v60, %v2343_v28  ;;  %v757_v7 = vsub.f32 %v740_v19, %v1146_v25  ;;  %v266_v24 = vld [vmem:[%s2272_s0 + $0x20] sm:$0xff]  ;;  %v1148_v30 = vld [vmem:[%s2279_s7 + $0xb8] sm:$0xff]  ;;  %v2345_v34 = vld [vmem:[#allocation8_spill] sm:$0xff]  ;;  %p1206_p3 = por %p1205_p2, %p1204_p1 }
  0x46   :  { %v763_v29 = vand.u32 2147483647, %v755_v20  ;;  %v768_v43 = vadd.f32 %v761_v40, %v760_v41  ;;  %v271_v63 = vsub.f32 %v263_v2, %v2344_v42  ;;  %v667_v52 = vadd.f32 %v666_v5, %v660_v33  ;;  %v2346_v14 = vld [vmem:[#allocation9_spill] sm:$0xff]  ;;  %v267_v56 = vld [vmem:[%s2272_s0 + $0x28] sm:$0xff]  ;;  %v2347_v53 = vld [vmem:[#allocation10_spill] sm:$0xff] }
  0x47   :  { %v718_v0 = vand.u32 2147483647, %v710_v61  ;;  %v272_v36 = vsub.f32 %v264_v1, %v2345_v34  ;;  %v273_v57 = vsub.f32 %v265_v8, %v2346_v14  ;;  %v724_v47 = vadd.f32 %v723_v9, %v717_v59  ;;  %v268_v18 = vld [vmem:[%s2272_s0 + $0x30] sm:$0xff]  ;;  %v2348_v21 = vld [vmem:[#allocation11_spill] sm:$0xff]  ;;  %v269_v46 = vld [vmem:[%s2272_s0 + $0x38] sm:$0xff]  ;;  %p1207_p4 = pnand %p1206_p3, %p1200_p0 }
  0x48   :  { %v758_v3 = vsub.f32 %v741_v50, %v1147_v51  ;;  %v764_v26 = vand.u32 2147483647, %v756_v10  ;;  %v769_v32 = vadd.f32 %v768_v43, %v762_v49  ;;  %v274_v12 = vsub.f32 %v266_v24, %v2347_v53  ;;  %v2349_v54 = vld [vmem:[#allocation12_spill] sm:$0xff]  ;;  %v2350_v11 = vld [vmem:[#allocation13_spill] sm:$0xff]  ;;  %v1901_v59 = vld [vmem:[%s2280_s8] sm:$0xff] }
  0x49   :  { %v278_v33 = vand.u32 2147483647, %v270_v6  ;;  %v279_v31 = vand.u32 2147483647, %v271_v63  ;;  %v280_v58 = vand.u32 2147483647, %v272_v36  ;;  %v759_v44 = vsub.f32 %v742_v35, %v1148_v30 }
  0x4a   :  { %v765_v16 = vand.u32 2147483647, %v757_v7  ;;  %v770_v17 = vadd.f32 %v769_v32, %v763_v29  ;;  %v275_v4 = vsub.f32 %v267_v56, %v2348_v21  ;;  %v281_v37 = vand.u32 2147483647, %v273_v57  ;;  %v1906_v41 = vld [vmem:[%s2280_s8 + $0x8] sm:$0xff]  ;;  %v1911_v2 = vld [vmem:[%s2280_s8 + $0x10] sm:$0xff] }
  0x4b   :  { %v286_v38 = vadd.f32 %v279_v31, %v278_v33  ;;  %v668_v22 = vadd.f32 %v667_v52, %v619_v48  ;;  %v725_v23 = vadd.f32 %v724_v47, %v718_v0  ;;  %v766_v55 = vand.u32 2147483647, %v758_v3  ;;  %v1916_v9 = vld [vmem:[%s2280_s8 + $0x18] sm:$0xff]  ;;  %v1921_v40 = vld [vmem:[%s2280_s8 + $0x20] sm:$0xff]  ;;  %v1926_v49 = vld [vmem:[%s2280_s8 + $0x28] sm:$0xff] }
  0x4c   :  { %v771_v45 = vadd.f32 %v770_v17, %v764_v26  ;;  %v276_v61 = vsub.f32 %v268_v18, %v2349_v54  ;;  %v282_v62 = vand.u32 2147483647, %v274_v12  ;;  %v767_v39 = vand.u32 2147483647, %v759_v44  ;;  %v1931_v1 = vld [vmem:[%s2280_s8 + $0x30] sm:$0xff]  ;;  %v1936_v35 = vld [vmem:[%s2280_s8 + $0x38] sm:$0xff] }
  0x4d   :  { %v287_v15 = vadd.f32 %v286_v38, %v280_v58  ;;  %v277_v19 = vsub.f32 %v269_v46, %v2350_v11  ;;  %v283_v27 = vand.u32 2147483647, %v275_v4  ;;  %v726_v60 = vadd.f32 %v725_v23, %v668_v22  ;;  %v2351_v31 = vld [vmem:[#allocation14_spill] sm:$0xff]  ;;  %v2352_v22 = vld [vmem:[#allocation15_spill] sm:$0xff]  ;;  %v2354_v54 = vld [vmem:[#allocation17_spill] sm:$0xff] }
  0x4e   :  { %v772_v13 = vadd.f32 %v771_v45, %v765_v16  ;;  %v284_v50 = vand.u32 2147483647, %v276_v61  ;;  %v812_v51 = vand.u32 2147483647, %v1901_v59  ;;  %v813_v6 = vand.u32 2147483647, %v1906_v41 }
  0x4f   :  { %v288_v20 = vadd.f32 %v287_v15, %v281_v37  ;;  %v285_v8 = vand.u32 2147483647, %v277_v19  ;;  %v814_v7 = vand.u32 2147483647, %v1911_v2  ;;  %v815_v29 = vand.u32 2147483647, %v1916_v9 }
  0x50   :  { %v773_v5 = vadd.f32 %v772_v13, %v766_v55  ;;  %v816_v24 = vand.u32 2147483647, %v1921_v40  ;;  %v817_v42 = vand.u32 2147483647, %v1926_v49  ;;  %v818_v63 = vand.u32 2147483647, %v1931_v1 }
  0x51   :  { %v289_v25 = vadd.f32 %v288_v20, %v282_v62  ;;  %v820_v52 = vsub.f32 0.0, %v812_v51  ;;  %v821_v0 = vsub.f32 0.0, %v813_v6  ;;  %v822_v30 = vsub.f32 0.0, %v814_v7  ;;  %v2353_v55 = vld [vmem:[#allocation16_spill] sm:$0xff]  ;;  %v2355_v62 = vld [vmem:[#allocation18_spill] sm:$0xff]  ;;  %v298_v19 = vld [vmem:[%s2274_s2 + $0x8] sm:$0xff] }
  0x52   :  { %v774_v10 = vadd.f32 %v773_v5, %v767_v39  ;;  %v819_v36 = vand.u32 2147483647, %v1936_v35  ;;  %v823_v14 = vsub.f32 0.0, %v815_v29  ;;  %v824_v57 = vsub.f32 0.0, %v816_v24  ;;  %v2356_v39 = vld [vmem:[#allocation19_spill] sm:$0xff]  ;;  %v297_v11 = vld [vmem:[%s2274_s2] sm:$0xff] }
  0x53   :  { %v290_v48 = vadd.f32 %v289_v25, %v283_v27  ;;  %v825_v47 = vsub.f32 0.0, %v817_v42  ;;  %v828_v3 = vmul.f32 1.442695, %v820_v52  ;;  %v830_v26 = vmul.f32 1.442695, %v821_v0  ;;  %v2357_v20 = vld [vmem:[#allocation20_spill] sm:$0xff] }
  0x54   :  { %v775_v28 = vadd.f32 %v774_v10, %v726_v60  ;;  %v826_v32 = vsub.f32 0.0, %v818_v63  ;;  %v832_v56 = vmul.f32 1.442695, %v822_v30  ;;  %v834_v53 = vmul.f32 1.442695, %v823_v14  ;;  %v299_v5 = vld [vmem:[%s2274_s2 + $0x10] sm:$0xff] }
  0x55   :  { %v291_v43 = vadd.f32 %v290_v48, %v284_v50  ;;  %1165 = vpow2.f32 %v828_v3  ;;  %v836_v12 = vmul.f32 1.442695, %v824_v57  ;;  %v827_v33 = vsub.f32 0.0, %v819_v36  ;;  %v321_v50 = vld [vmem:[%s2275_s3] sm:$0xff]  ;;  %v322_v10 = vld [vmem:[%s2275_s3 + $0x8] sm:$0xff]  ;;  %v2030_v42 = vld [vmem:[%s2275_s3 + $0x30] sm:$0xff] }
  0x56   :  { %963 = vadd.xlane.f32.xlu1 %v775_v28  ;;  %1167 = vpow2.f32 %v830_v26  ;;  %v796_v58 = vmul.f32 %v1901_v59, %v2351_v31  ;;  %v838_v44 = vmul.f32 1.442695, %v825_v47  ;;  %v788_v16 = vmax.f32 %v1901_v59, 0.0  ;;  %v300_v59 = vld [vmem:[%s2274_s2 + $0x18] sm:$0xff]  ;;  %v2003_v48 = vld [vmem:[%s2274_s2 + $0x28] sm:$0xff]  ;;  %v325_v51 = vld [vmem:[%s2275_s3 + $0x20] sm:$0xff] }
  0x57   :  { %v292_v34 = vadd.f32 %v291_v43, %v285_v8  ;;  %1169 = vpow2.f32 %v832_v56  ;;  %v789_v17 = vmax.f32 %v1906_v41, 0.0  ;;  %v840_v18 = vmul.f32 1.442695, %v826_v32  ;;  %v2020_v43 = vld [vmem:[%s2274_s2 + $0x30] sm:$0xff]  ;;  %v2025_v24 = vld [vmem:[%s2275_s3 + $0x28] sm:$0xff] }
  0x58   :  { %1171 = vpow2.f32 %v834_v53  ;;  %v790_v21 = vmax.f32 %v1911_v2, 0.0  ;;  %v791_v4 = vmax.f32 %v1916_v9, 0.0  ;;  %v792_v37 = vmax.f32 %v1921_v40, 0.0  ;;  %v2041_v53 = vld [vmem:[%s2274_s2 + $0x38] sm:$0xff] }
  0x59   :  { %939 = vadd.xlane.f32.xlu0 %v292_v34  ;;  %1173 = vpow2.f32 %v836_v12  ;;  %v793_v38 = vmax.f32 %v1926_v49, 0.0  ;;  %v797_v23 = vmul.f32 %v1906_v41, %v2352_v22  ;;  %v798_v45 = vmul.f32 %v1911_v2, %v2353_v55  ;;  %v2358_v41 = vld [vmem:[#allocation21_spill] sm:$0xff] }
  0x5a   :  { %v842_v46 = vmul.f32 1.442695, %v827_v33  ;;  %v799_v61 = vmul.f32 %v1916_v9, %v2354_v54  ;;  %v800_v15 = vmul.f32 %v1921_v40, %v2355_v62  ;;  %v801_v13 = vmul.f32 %v1926_v49, %v2356_v39  ;;  %v301_v9 = vld [vmem:[%s2274_s2 + $0x20] sm:$0xff]  ;;  %v323_v40 = vld [vmem:[%s2275_s3 + $0x10] sm:$0xff]  ;;  %v2046_v12 = vld [vmem:[%s2275_s3 + $0x38] sm:$0xff] }
  0x5b   :  { %1175 = vpow2.f32 %v838_v44  ;;  %v794_v27 = vmax.f32 %v1931_v1, 0.0  ;;  %v802_v60 = vmul.f32 %v1931_v1, %v2357_v20  ;;  %v795_v25 = vmax.f32 %v1936_v35, 0.0 }
  0x5c   :  { %1177 = vpow2.f32 %v840_v18  ;;  %v803_v2 = vmul.f32 %v1936_v35, %v2358_v41  ;;  %v1994_v49 = vsub.f32 %v788_v16, %v796_v58  ;;  %v1996_v1 = vsub.f32 %v789_v17, %v797_v23  ;;  %v324_v35 = vld [vmem:[%s2275_s3 + $0x18] sm:$0xff]  ;;  %v1001_v18 = vld [vmem:[%s2282_s10] sm:$0x3] }
  0x5d   :  { %v1998_v8 = vsub.f32 %v790_v21, %v798_v45  ;;  %1179 = vpow2.f32 %v842_v46  ;;  %v2011_v6 = vsub.f32 %v791_v4, %v799_v61  ;;  %v2013_v7 = vsub.f32 %v792_v37, %v800_v15 }
  0x5e   :  { %v2015_v29 = vsub.f32 %v793_v38, %v801_v13  ;;  %v345_v63 = vsub.f32 %v297_v11, %v321_v50  ;;  %v2032_v0 = vsub.f32 %v794_v27, %v802_v60  ;;  %v346_v34 = vsub.f32 %v298_v19, %v322_v10 }
  0x5f   :  { %v1166_v28 = vpop.eup %1165  ;;  %v347_v36 = vsub.f32 %v299_v5, %v323_v40  ;;  %v2034_v57 = vsub.f32 %v795_v25, %v803_v2  ;;  %v348_v3 = vsub.f32 %v300_v59, %v324_v35  ;;  %v349_v26 = vsub.f32 %v301_v9, %v325_v51 }
  0x60   :  { %v1168_v52 = vpop.eup %1167  ;;  %v844_v30 = vadd.f32 1.0, %v1166_v28  ;;  %v350_v33 = vsub.f32 %v2003_v48, %v2025_v24  ;;  %v351_v31 = vsub.f32 %v2020_v43, %v2030_v42  ;;  %v847_v44 = vmul.f32 -0.5, %v1166_v28 }
  0x61   :  { %v1170_v14 = vpop.eup %1169  ;;  %v853_v47 = vadd.f32 1.0, %v1168_v52  ;;  %v856_v16 = vmul.f32 -0.5, %v1168_v52  ;;  %v369_v17 = vand.u32 2147483647, %v345_v63  ;;  %v370_v4 = vand.u32 2147483647, %v346_v34 }
  0x62   :  { %v2036_v32 = vpop.eup %1171  ;;  %1181 = vlog2.f32 %v844_v30  ;;  %v862_v56 = vadd.f32 1.0, %v1170_v14  ;;  %v2058_v37 = vand.u32 2147483647, %v347_v36  ;;  %v865_v22 = vmul.f32 -0.5, %v1170_v14  ;;  %v313_v30 = vld [vmem:[%s2274_s2 + $0x80] sm:$0xff] }
  0x63   :  { %v2052_v58 = vpop.eup %1173  ;;  %1183 = vlog2.f32 %v853_v47  ;;  %v871_v21 = vadd.f32 1.0, %v2036_v32  ;;  %v352_v23 = vsub.f32 %v2041_v53, %v2046_v12  ;;  %v2064_v55 = vand.u32 2147483647, %v348_v3  ;;  %v309_v53 = vld [vmem:[%s2274_s2 + $0x60] sm:$0xff] }
  0x64   :  { %1185 = vlog2.f32 %v862_v56  ;;  %v2066_v45 = vand.u32 2147483647, %v349_v26  ;;  %v850_v54 = vand.u32 2147483647, %v1166_v28  ;;  %v859_v61 = vand.u32 2147483647, %v1168_v52 }
  0x65   :  { %v2060_v38 = vpop.eup %1175  ;;  %1187 = vlog2.f32 %v871_v21  ;;  %v880_v62 = vadd.f32 1.0, %v2052_v58  ;;  %v848_v15 = vadd.f32 1.0, %v847_v44  ;;  %v857_v39 = vadd.f32 1.0, %v856_v16  ;;  %v333_v12 = vld [vmem:[%s2275_s3 + $0x60] sm:$0xff] }
  0x66   :  { %v2068_v46 = vpop.eup %1177  ;;  %v874_v13 = vmul.f32 -0.5, %v2036_v32  ;;  %v2072_v11 = vmul.f32 %v1001_v18, %v1001_v18  ;;  %v868_v27 = vand.u32 2147483647, %v1170_v14  ;;  %v883_v20 = vmul.f32 -0.5, %v2052_v58 }
  0x67   :  { %v2074_v19 = vpop.eup %1179  ;;  %1189 = vlog2.f32 %v880_v62  ;;  %v889_v60 = vadd.f32 1.0, %v2060_v38  ;;  %v866_v5 = vadd.f32 1.0, %v865_v22  ;;  %v877_v59 = vand.u32 2147483647, %v2036_v32 }
  0x68   :  { %v898_v50 = vadd.f32 1.0, %v2068_v46  ;;  %v393_v25 = vadd.f32 %v370_v4, %v369_v17  ;;  %vm2080_vm0 = vcmp.lt.f32.partialorder %v850_v54, 0.0004427343  ;;  %vm2084_vm1 = vcmp.lt.f32.partialorder %v859_v61, 0.0004427343 }
  0x69   :  { %1191 = vlog2.f32 %v889_v60  ;;  %v892_v9 = vmul.f32 -0.5, %v2060_v38  ;;  %v849_v10 = vmul.f32 %v1166_v28, %v848_v15  ;;  %v875_v40 = vadd.f32 1.0, %v874_v13 }
  0x6a   :  { %1193 = vlog2.f32 %v898_v50  ;;  %v907_v35 = vadd.f32 1.0, %v2074_v19  ;;  %v858_v63 = vmul.f32 %v1168_v52, %v857_v39  ;;  %vm2090_vm2 = vcmp.lt.f32.partialorder %v868_v27, 0.0004427343 }
  0x6b   :  { %v884_v34 = vadd.f32 1.0, %v883_v20  ;;  %v901_v36 = vmul.f32 -0.5, %v2068_v46  ;;  %v867_v26 = vmul.f32 %v1170_v14, %v866_v5  ;;  %vm2095_vm3 = vcmp.lt.f32.partialorder %v877_v59, 0.0004427343 }
  0x6c   :  { %v1182_v51 = vpop.eup %1181  ;;  %1195 = vlog2.f32 %v907_v35  ;;  %v886_v16 = vand.u32 2147483647, %v2052_v58  ;;  %v893_v52 = vadd.f32 1.0, %v892_v9  ;;  %v910_v17 = vmul.f32 -0.5, %v2074_v19 }
  0x6d   :  { %v1184_v47 = vpop.eup %1183  ;;  %v846_v3 = vmul.f32 0.6931472, %v1182_v51  ;;  %v876_v4 = vmul.f32 %v2036_v32, %v875_v40  ;;  %v895_v14 = vand.u32 2147483647, %v2060_v38  ;;  %v885_v61 = vmul.f32 %v2052_v58, %v884_v34 }
  0x6e   :  { %v1186_v28 = vpop.eup %1185  ;;  %v855_v44 = vmul.f32 0.6931472, %v1184_v47  ;;  %v902_v62 = vadd.f32 1.0, %v901_v36  ;;  %v904_v27 = vand.u32 2147483647, %v2068_v46  ;;  %v894_v5 = vmul.f32 %v2060_v38, %v893_v52 }
  0x6f   :  { %v852_v18 = vsel %vm2080_vm0, %v849_v10, %v846_v3  ;;  %v864_v21 = vmul.f32 0.6931472, %v1186_v28  ;;  %v1188_v22 = vpop.eup %1187  ;;  %vm2113_vm4 = vcmp.lt.f32.partialorder %v886_v16, 0.0004427343  ;;  %v911_v59 = vadd.f32 1.0, %v910_v17  ;;  %v306_v17 = vld [vmem:[%s2274_s2 + $0x48] sm:$0xff] }
  0x70   :  { %v861_v54 = vsel %vm2084_vm1, %v858_v63, %v855_v44  ;;  %v916_v15 = vadd.f32 %v852_v18, %v1994_v49  ;;  %v873_v13 = vmul.f32 0.6931472, %v1188_v22  ;;  %v913_v41 = vand.u32 2147483647, %v2074_v19  ;;  %v1149_v38 = vld [vmem:[%s2282_s10 + $0x2] sm:$0x3] }
  0x71   :  { %v870_v39 = vsel %vm2090_vm2, %v867_v26, %v864_v21  ;;  %v917_v20 = vadd.f32 %v861_v54, %v1996_v1  ;;  %v1190_v32 = vpop.eup %1189  ;;  %vm2122_vm5 = vcmp.lt.f32.partialorder %v895_v14, 0.0004427343  ;;  %v903_v10 = vmul.f32 %v2068_v46, %v902_v62  ;;  %v330_v18 = vld [vmem:[%s2275_s3 + $0x48] sm:$0xff]  ;;  %v336_v1 = vld [vmem:[%s2275_s3 + $0x78] sm:$0xff] }
  0x72   :  { %v918_v58 = vadd.f32 %v870_v39, %v1998_v8  ;;  %v879_v49 = vsel %vm2095_vm3, %v876_v4, %v873_v13  ;;  %v882_v50 = vmul.f32 0.6931472, %v1190_v32  ;;  %v374_v8 = vand.u32 2147483647, %v350_v33  ;;  %v1150_v33 = vld [vmem:[%s2282_s10 + $0x4] sm:$0x3] }
  0x73   :  { %v926_v2 = vadd.f32 %v917_v20, %v916_v15  ;;  %v1192_v9 = vpop.eup %1191  ;;  %v919_v40 = vadd.f32 %v879_v49, %v2011_v6  ;;  %vm2136_vm6 = vcmp.lt.f32.partialorder %v904_v27, 0.0004427343  ;;  %v912_v6 = vmul.f32 %v2074_v19, %v911_v59  ;;  %v305_v19 = vld [vmem:[%s2274_s2 + $0x40] sm:$0xff]  ;;  %v334_v59 = vld [vmem:[%s2275_s3 + $0x68] sm:$0xff] }
  0x74   :  { %v1194_v35 = vpop.eup %1193  ;;  %v888_v51 = vsel %vm2113_vm4, %v885_v61, %v882_v50  ;;  %v891_v63 = vmul.f32 0.6931472, %v1192_v9  ;;  %v394_v24 = vadd.f32 %v393_v25, %v2058_v37  ;;  %vm2148_vm7 = vcmp.lt.f32.partialorder %v913_v41, 0.0004427343  ;;  %v307_v61 = vld [vmem:[%s2274_s2 + $0x50] sm:$0xff]  ;;  %v312_v9 = vld [vmem:[%s2274_s2 + $0x78] sm:$0xff] }
  0x75   :  { %v927_v46 = vadd.f32 %v926_v2, %v918_v58  ;;  %v900_v34 = vmul.f32 0.6931472, %v1194_v35  ;;  %v920_v48 = vadd.f32 %v888_v51, %v2013_v7  ;;  %v329_v7 = vld [vmem:[%s2275_s3 + $0x40] sm:$0xff]  ;;  %v1007_v37 = vmul.f32 %v1149_v38, %v1149_v38  ;;  %v311_v41 = vld [vmem:[%s2274_s2 + $0x70] sm:$0xff] }
  0x76   :  { %v1196_v36 = vpop.eup %1195  ;;  %v897_v47 = vsel %vm2122_vm5, %v894_v5, %v891_v63  ;;  %v395_v44 = vadd.f32 %v394_v24, %v2064_v55  ;;  %v1009_v4 = vmul.f32 %v1150_v33, %v1150_v33  ;;  %v354_v15 = vsub.f32 %v306_v17, %v330_v18  ;;  %v310_v5 = vld [vmem:[%s2274_s2 + $0x68] sm:$0xff]  ;;  %v335_v2 = vld [vmem:[%s2275_s3 + $0x70] sm:$0xff]  ;;  %v316_v17 = vld [vmem:[%s2274_s2 + $0x98] sm:$0xff] }
  0x77   :  { %v928_v26 = vadd.f32 %v927_v46, %v919_v40  ;;  %v906_v25 = vsel %vm2136_vm6, %v903_v10, %v900_v34  ;;  %v909_v56 = vmul.f32 0.6931472, %v1196_v36  ;;  %v921_v28 = vadd.f32 %v897_v47, %v2015_v29  ;;  %v337_v46 = vld [vmem:[%s2275_s3 + $0x80] sm:$0xff]  ;;  %v314_v36 = vld [vmem:[%s2274_s2 + $0x88] sm:$0xff]  ;;  %v340_v18 = vld [vmem:[%s2275_s3 + $0x98] sm:$0xff] }
  0x78   :  { %v922_v16 = vadd.f32 %v906_v25, %v2032_v0  ;;  %v1008_v21 = vadd.f32 %v1007_v37, %v2072_v11  ;;  %v353_v29 = vsub.f32 %v305_v19, %v329_v7  ;;  %v375_v0 = vand.u32 2147483647, %v351_v31  ;;  %v331_v11 = vld [vmem:[%s2275_s3 + $0x50] sm:$0xff]  ;;  %v338_v47 = vld [vmem:[%s2275_s3 + $0x88] sm:$0xff] }
  0x79   :  { %v929_v52 = vadd.f32 %v928_v26, %v920_v48  ;;  %v915_v14 = vsel %vm2148_vm7, %v912_v6, %v909_v56  ;;  %v396_v55 = vadd.f32 %v395_v44, %v2066_v45  ;;  %v376_v43 = vand.u32 2147483647, %v352_v23  ;;  %v332_v45 = vld [vmem:[%s2275_s3 + $0x58] sm:$0xff]  ;;  %v315_v37 = vld [vmem:[%s2274_s2 + $0x90] sm:$0xff] }
  0x7a   :  { %v923_v22 = vadd.f32 %v915_v14, %v2034_v57  ;;  %v1010_v62 = vadd.f32 %v1009_v4, %v1008_v21  ;;  %v308_v57 = vld [vmem:[%s2274_s2 + $0x58] sm:$0xff]  ;;  %v355_v39 = vsub.f32 %v307_v61, %v331_v11  ;;  %v377_v13 = vand.u32 2147483647, %v353_v29  ;;  %v339_v25 = vld [vmem:[%s2275_s3 + $0x90] sm:$0xff] }
  0x7b   :  { %v930_v54 = vadd.f32 %v929_v52, %v921_v28  ;;  %v397_v42 = vadd.f32 %v396_v55, %v374_v8  ;;  %v356_v23 = vsub.f32 %v308_v57, %v332_v45  ;;  %v378_v32 = vand.u32 2147483647, %v354_v15  ;;  %v341_v55 = vld [vmem:[%s2275_s3 + $0xa0] sm:$0xff]  ;;  %v342_v15 = vld [vmem:[%s2275_s3 + $0xa8] sm:$0xff]  ;;  %v319_v57 = vld [vmem:[%s2274_s2 + $0xb0] sm:$0xff] }
  0x7c   :  { %1197 = vrsqrt.f32 %v1010_v62  ;;  %v357_v58 = vsub.f32 %v309_v53, %v333_v12  ;;  %v379_v49 = vand.u32 2147483647, %v355_v39  ;;  %v358_v10 = vsub.f32 %v310_v5, %v334_v59  ;;  %v343_v45 = vld [vmem:[%s2275_s3 + $0xb0] sm:$0xff]  ;;  %v344_v53 = vld [vmem:[%s2275_s3 + $0xb8] sm:$0xff] }
  0x7d   :  { %v931_v31 = vadd.f32 %v930_v54, %v922_v16  ;;  %v398_v27 = vadd.f32 %v397_v42, %v375_v0  ;;  %v380_v40 = vand.u32 2147483647, %v356_v23  ;;  %v359_v38 = vsub.f32 %v311_v41, %v335_v2  ;;  %v317_v0 = vld [vmem:[%s2274_s2 + $0xa0] sm:$0xff] }
  0x7e   :  { %v381_v35 = vand.u32 2147483647, %v357_v58  ;;  %v360_v34 = vsub.f32 %v312_v9, %v336_v1  ;;  %vm1013_vm8 = vcmp.eq.f32.partialorder %v1010_v62, inf  ;;  %v1016_v6 = vand.u32 2147483648, %v1010_v62  ;;  %v986_v2 = vld [vmem:[%s2281_s9] sm:$0x3] }
  0x7f   :  { %v932_v20 = vadd.f32 %v931_v31, %v923_v22  ;;  %v399_v60 = vadd.f32 %v398_v27, %v376_v43  ;;  %v382_v48 = vand.u32 2147483647, %v358_v10  ;;  %vm1015_vm9 = vcmp.eq.f32.partialorder %v1010_v62, 0.0 }
  0x80   :  { %v361_v3 = vsub.f32 %v313_v30, %v337_v46  ;;  %v383_v26 = vand.u32 2147483647, %v359_v38  ;;  %v362_v28 = vsub.f32 %v314_v36, %v338_v47  ;;  %v384_v44 = vand.u32 2147483647, %v360_v34 }
  0x81   :  { %975 = vadd.xlane.f32.xlu1 %v932_v20  ;;  %v400_v50 = vadd.f32 %v399_v60, %v377_v13  ;;  %vm988_vm10 = vcmask 1041408   ;;  %v363_v21 = vsub.f32 %v315_v37, %v339_v25  ;;  %v364_v22 = vsub.f32 %v316_v17, %v340_v18  ;;  %v320_v20 = vld [vmem:[%s2274_s2 + $0xb8] sm:$0xff] }
  0x82   :  { %v385_v4 = vand.u32 2147483647, %v361_v3  ;;  %v386_v54 = vand.u32 2147483647, %v362_v28  ;;  %v365_v43 = vsub.f32 %v317_v0, %v341_v55  ;;  %v367_v12 = vsub.f32 %v319_v57, %v343_v45 }
  0x83   :  { %v401_v8 = vadd.f32 %v400_v50, %v378_v32  ;;  %v387_v42 = vand.u32 2147483647, %v363_v21  ;;  %v388_v13 = vand.u32 2147483647, %v364_v22  ;;  %v368_v60 = vsub.f32 %v320_v20, %v344_v53 }
  0x84   :  { %v389_v23 = vand.u32 2147483647, %v365_v43  ;;  %v391_v58 = vand.u32 2147483647, %v367_v12  ;;  %v987_v1 = vmul.f32 %v986_v2, %v986_v2 }
  0x85   :  { %v402_v51 = vadd.f32 %v401_v8, %v379_v49  ;;  %v392_v50 = vand.u32 2147483647, %v368_v60 }
  0x86   :  { %v1198_v63 = vpop.eup %1197 }
  0x87   :  { %v403_v24 = vadd.f32 %v402_v51, %v380_v40  ;;  %v1012_v33 = vmul.f32 %v1198_v63, %v1010_v62  ;;  %v989_v40 = vsel %vm988_vm10, %v987_v1, 0.0 }
  0x89   :  { %v404_v19 = vadd.f32 %v403_v24, %v381_v35  ;;  %v1014_v7 = vsel %vm1013_vm8, %v1010_v62, %v1012_v33  ;;  %v318_v62 = vld [vmem:[%s2274_s2 + $0xa8] sm:$0xff] }
  0x8a   :  { %v1017_v56 = vsel %vm1015_vm9, %v1016_v6, %v1014_v7  ;;  %v366_v39 = vsub.f32 %v318_v62, %v342_v15 }
  0x8b   :  { %v405_v16 = vadd.f32 %v404_v19, %v382_v48  ;;  %v1151_v52 = vadd.f32 -1.0, %v1017_v56 }
  0x8c   :  { %v390_v5 = vand.u32 2147483647, %v366_v39 }
  0x8d   :  { %v406_v14 = vadd.f32 %v405_v16, %v383_v26  ;;  %v1019_v29 = vmul.f32 %v1151_v52, %v1151_v52 }
  0x8f   :  { %v407_v61 = vadd.f32 %v406_v14, %v384_v44  ;;  %v1020_v11 = vsel %vm988_vm10, %v1019_v29, 0.0 }
  0x90   :  { %1021 = vadd.xlane.f32.xlu1 %v1020_v11 }
  0x91   :  { %v408_v31 = vadd.f32 %v407_v61, %v385_v4 }
  0x93   :  { %v409_v27 = vadd.f32 %v408_v31, %v386_v54 }
  0x95   :  { %v410_v32 = vadd.f32 %v409_v27, %v387_v42 }
  0x97   :  { %v411_v59 = vadd.f32 %v410_v32, %v388_v13 }
  0x99   :  { %v412_v49 = vadd.f32 %v411_v59, %v389_v23 }
  0x9b   :  { %v413_v41 = vadd.f32 %v412_v49, %v390_v5 }
  0x9d   :  { %v414_v9 = vadd.f32 %v413_v41, %v391_v58 }
  0x9f   :  { %v415_v10 = vadd.f32 %v414_v9, %v392_v50 }
  0xa1   :  { %951 = vadd.xlane.f32.xlu0 %v415_v10 }
  0xa5   :  { %990 = vadd.xlane.f32.xlu0 %v989_v40 }
  0xe3   :  { %v964_v34 = vpop.xlane.xlu1 %963 }
  0xe4   :  { %v965_v33 = vrot.slane %v964_v34, 4 }
  0xe6   :  { %v940_v8 = vpop.xlane.xlu0 %939  ;;  %v966_v3 = vadd.f32 %v965_v33, %v964_v34 }
  0xe7   :  { %v941_v38 = vrot.slane %v940_v8, 4 }
  0xe8   :  { %v967_v7 = vrot.slane %v966_v3, 2 }
  0xe9   :  { %v942_v35 = vadd.f32 %v941_v38, %v940_v8 }
  0xea   :  { %v968_v52 = vadd.f32 %v967_v7, %v966_v3 }
  0xeb   :  { %v943_v51 = vrot.slane %v942_v35, 2 }
  0xec   :  { %v969_v0 = vrot.slane %v968_v52, 1 }
  0xed   :  { %v944_v63 = vadd.f32 %v943_v51, %v942_v35 }
  0xee   :  { %v970_v15 = vadd.f32 %v969_v0, %v968_v52 }
  0xef   :  { %v945_v30 = vrot.slane %v944_v63, 1 }
  0xf1   :  { %v946_v46 = vadd.f32 %v945_v30, %v944_v63 }
  0xf3   :  { %1152 = vpush %v946_v46 }
 0x10e   :  { %v976_v6 = vpop.xlane.xlu1 %975 }
 0x10f   :  { %v977_v48 = vrot.slane %v976_v6, 4 }
 0x111   :  { %v978_v47 = vadd.f32 %v977_v48, %v976_v6 }
 0x113   :  { %v979_v19 = vrot.slane %v978_v47, 2 }
 0x115   :  { %v980_v44 = vadd.f32 %v979_v19, %v978_v47 }
 0x117   :  { %v981_v29 = vrot.slane %v980_v44, 1 }
 0x119   :  { %v982_v62 = vadd.f32 %v981_v29, %v980_v44 }
 0x11d   :  { %v1022_v24 = vpop.xlane.xlu1 %1021 }
 0x11e   :  { %v1023_v36 = vrot.slane %v1022_v24, 4 }
 0x120   :  { %v1024_v26 = vadd.f32 %v1023_v36, %v1022_v24 }
 0x122   :  { %v1025_v56 = vrot.slane %v1024_v26, 2 }
 0x124   :  { %s1153_s2 = spop %1152  ;;  %v1026_v21 = vadd.f32 %v1025_v56, %v1024_v26 }
 0x125   :  { %949 = sst [smem:[#allocation3]] %s1153_s2 }
 0x126   :  { %v1027_v54 = vrot.slane %v1026_v21, 1 }
 0x128   :  { %v1028_v42 = vadd.f32 %v1027_v54, %v1026_v21 }
 0x12e   :  { %v952_v37 = vpop.xlane.xlu0 %951 }
 0x12f   :  { %v953_v25 = vrot.slane %v952_v37, 4 }
 0x131   :  { %v954_v28 = vadd.f32 %v953_v25, %v952_v37 }
 0x132   :  { %v991_v16 = vpop.xlane.xlu0 %990 }
 0x133   :  { %v955_v17 = vrot.slane %v954_v28, 2  ;;  %v992_v18 = vrot.slane %v991_v16, 4 }
 0x135   :  { %v993_v4 = vadd.f32 %v992_v18, %v991_v16  ;;  %v956_v14 = vadd.f32 %v955_v17, %v954_v28 }
 0x137   :  { %v994_v55 = vrot.slane %v993_v4, 2  ;;  %v957_v22 = vrot.slane %v956_v14, 1 }
 0x139   :  { %v995_v61 = vadd.f32 %v994_v55, %v993_v4  ;;  %v958_v11 = vadd.f32 %v957_v22, %v956_v14 }
 0x13b   :  { %1154 = vpush %v958_v11  ;;  %v996_v43 = vrot.slane %v995_v61, 1 }
 0x13c   :  { %1156 = vpush %v970_v15 }
 0x13d   :  { %1158 = vpush %v982_v62  ;;  %v997_v31 = vadd.f32 %v996_v43, %v995_v61 }
 0x13f   :  { %1160 = vpush %v997_v31 }
 0x140   :  { %1162 = vpush %v1028_v42 }
 0x16c   :  { %s1155_s3 = spop %1154 }
 0x16d   :  { %961 = sst [smem:[#allocation3 + $0x1]] %s1155_s3  ;;  %s1157_s5 = spop %1156 }
 0x16e   :  { %973 = sst [smem:[#allocation3 + $0x2]] %s1157_s5  ;;  %s1159_s8 = spop %1158 }
 0x16f   :  { %985 = sst [smem:[#allocation3 + $0x3]] %s1159_s8 }
 0x170   :  { %s1161_s29 = spop %1160 }
 0x171   :  { %1000 = sst [smem:[#allocation3 + $0x4]] %s1161_s29  ;;  %s1163_s30 = spop %1162 }
 0x172   :  { %1031 = sst [smem:[#allocation3 + $0x5]] %s1163_s30 }
 0x173   :  { %1210 = shalt.err (!%p1207_p4)
}
 0x174   :  { %s1213_s13 = smov [#allocation3]  }
 0x175   :  { %1041 = dma.smem_to_vmem %s1213_s13, 16, %s1039_s28, [#allocation4]  }
 0x176   :  { %1211 = dma.done.wait [#allocation4], 16  }
 0x177   :  { %1212 = vsyncadd [#allocation4], 4294967280 }
 0x178   :  { %1045 = sfence }
 0x179   :  { %1046 = vsyncpa [#allocation4], 1 }

</bundles_post_ra>
